<compile_context>
chip_gen: v5e
topology: v5e:2x2
jax: 0.10.0
libtpu: 0.0.40
codegen_flags: <defaults>
</compile_context>

<pallas_src>
import functools

import jax
import jax.numpy as jnp
from jax import lax
from jax.experimental import pallas as pl
from jax.experimental.pallas import tpu as pltpu


def _round_up(x, m):
    return ((x + m - 1) // m) * m


def _cdiv(a, b):
    return (a + b - 1) // b


def _pad_to(a, axis, target):
    pad = target - a.shape[axis]
    if pad == 0:
        return a
    widths = [(0, 0)] * a.ndim
    widths[axis] = (0, pad)
    return jnp.pad(a, widths)


def _device_kind():
    try:
        return jax.devices()[0].device_kind.lower()
    except Exception:  # pragma: no cover - CPU/interpret fallback
        return ""


def _num_tensorcores_per_chip():
    # v7x has 2 TensorCores per chip; v5e/v6e have 1.
    return 2 if "v7" in _device_kind() else 1


def _default_compute_dtype():
    # bf16 VPU/EUP exists on v6e and later; keep f32 on v5e and older.
    kind = _device_kind()
    for tag in ("v6", "v7", "v8"):
        if tag in kind:
            return jnp.bfloat16
    return jnp.float32


def kancd_kernel(stu_ref, exer_ref, kp_ref, edisc_ref, kemb_ref,
                 w1_ref, b1_ref, w2_ref, b2_ref, w3_ref, b3_ref,
                 out_ref):
    cdt = stu_ref.dtype
    rhs_t = (((1,), (1,)), ((), ()))      # contract last dims: A @ B^T (q@k^T form)

    # ---- MF stage: stat / k_difficulty against the resident knowledge_emb ------
    # (Bt, D) x (Kp, D)^T -> (Bt, Kp); batch-major tiles straight from row gathers,
    # no wrapper- or kernel-side transposes.
    kemb = kemb_ref[...]
    stat = jax.nn.sigmoid(
        lax.dot_general(stu_ref[...], kemb, rhs_t,
                        preferred_element_type=jnp.float32).astype(cdt))
    kdiff = jax.nn.sigmoid(
        lax.dot_general(exer_ref[...], kemb, rhs_t,
                        preferred_element_type=jnp.float32).astype(cdt))

    edisc = jax.nn.sigmoid(edisc_ref[...]).astype(cdt)          # (Bt, 1)
    x = edisc * (stat - kdiff) * kp_ref[...]                    # (Bt, Kp)

    # ---- prednet_full1: PosLinear(K -> 256), tanh (dropout = identity) ---------
    # |W1| (L1, Kp) x x^T -> (L1, Bt): feature-major from here on (lane = batch).
    h1 = jnp.tanh(
        (lax.dot_general(w1_ref[...], x, rhs_t,
                         preferred_element_type=jnp.float32) + b1_ref[...]).astype(cdt))

    # ---- prednet_full2: PosLinear(256 -> 128), tanh ----------------------------
    h2 = jnp.tanh(
        (jnp.dot(w2_ref[...], h1,
                 preferred_element_type=jnp.float32) + b2_ref[...]).astype(cdt))

    # ---- prednet_full3: PosLinear(128 -> 1), sigmoid ---------------------------
    # VPU broadcast-multiply + cross-sublane reduce; lane-dense (1, Bt) store.
    # TODO(synk): could be an MXU dot (|w3| (1,128) x h2) if a bundle dump shows
    # the VALU/XLU slot (not the EUP) is binding.
    z = jnp.sum(h2.astype(jnp.float32) * w3_ref[...], axis=0, keepdims=True) + b3_ref[...]
    out_ref[...] = jax.nn.sigmoid(z)


@functools.partial(jax.jit, static_argnames=("batch_tile", "compute_dtype"))
def kancd_forward(params, stu_id, input_exercise, input_knowledge_point,
                  *, batch_tile=2048, compute_dtype=None):
    """Contiguous row gathers + padding (plain-JAX glue) + one gridded pallas_call.

    Returns a (B,) probability vector, matching Net.forward(...).view(-1).
    """
    if compute_dtype is None:
        compute_dtype = _default_compute_dtype()
    cdt = compute_dtype

    kemb = params["knowledge_emb"]                    # (K, D)
    K, D = kemb.shape
    w1, b1 = params["w1"], params["b1"]               # (256, K), (256,)
    w2, b2 = params["w2"], params["b2"]               # (128, 256), (128,)
    w3, b3 = params["w3"], params["b3"]               # (1, 128), (1,)
    L1, L2 = w1.shape[0], w2.shape[0]

    # ---- batch-tile selection: big, balanced, and >= num_cores grid steps ------
    B = stu_id.shape[0]
    ncores = _num_tensorcores_per_chip()
    steps = max(1, _cdiv(B, max(batch_tile, 128)))
    if ncores > 1:
        steps = _round_up(steps, ncores)              # keep both v7x TCs busy
    bt = _round_up(_cdiv(B, steps), 128)              # lane-dense batch tile
    bp = _round_up(B, bt)
    kp_dim = _round_up(K, 8)                          # cheap, keeps K padding exact

    # ---- contiguous row gathers (tables are row-major (N, D)) ------------------
    stu = jnp.take(params["student_emb"], stu_id, axis=0).astype(cdt)        # (B, D)
    exer = jnp.take(params["exercise_emb"], input_exercise, axis=0).astype(cdt)  # (B, D)
    edisc = jnp.take(params["e_discrimination"], input_exercise, axis=0)     # (B, 1) f32
    kp = input_knowledge_point.astype(cdt)                                   # (B, K)

    # PosLinear weight 2*relu(-w)+w == |w|, hoisted out of the kernel (one XLA op).
    w1_abs = jnp.abs(w1).astype(cdt)
    w2_abs = jnp.abs(w2).astype(cdt)
    w3_abs = jnp.abs(w3).reshape(L2, 1).astype(jnp.float32)
    kemb_c = kemb.astype(cdt)

    # Zero padding.  Padded K rows/cols are exact (sigmoid(0)-sigmoid(0)=0, kp and
    # w1 padding are zero); padded batch rows are sliced off at the end.
    stu = _pad_to(stu, 0, bp)
    exer = _pad_to(exer, 0, bp)
    edisc = _pad_to(edisc, 0, bp)
    kp = _pad_to(_pad_to(kp, 1, kp_dim), 0, bp)
    kemb_p = _pad_to(kemb_c, 0, kp_dim)
    w1_p = _pad_to(w1_abs, 1, kp_dim)

    tile_specs = [
        pl.BlockSpec((bt, D), lambda i: (i, 0)),        # stu  (batch-major rows)
        pl.BlockSpec((bt, D), lambda i: (i, 0)),        # exer
        pl.BlockSpec((bt, kp_dim), lambda i: (i, 0)),   # knowledge points
        pl.BlockSpec((bt, 1), lambda i: (i, 0)),        # e_discrimination
    ]
    resident_specs = [                                   # constant index -> resident
        pl.BlockSpec((kp_dim, D), lambda i: (0, 0)),    # knowledge_emb
        pl.BlockSpec((L1, kp_dim), lambda i: (0, 0)),   # |w1|
        pl.BlockSpec((L1, 1), lambda i: (0, 0)),        # b1
        pl.BlockSpec((L2, L1), lambda i: (0, 0)),       # |w2|
        pl.BlockSpec((L2, 1), lambda i: (0, 0)),        # b2
        pl.BlockSpec((L2, 1), lambda i: (0, 0)),        # |w3| (stored as a column)
        pl.BlockSpec((1, 1), lambda i: (0, 0)),         # b3
    ]

    out = pl.pallas_call(
        kancd_kernel,
        out_shape=jax.ShapeDtypeStruct((1, bp), jnp.float32),
        grid=(bp // bt,),
        in_specs=tile_specs + resident_specs,
        out_specs=pl.BlockSpec((1, bt), lambda i: (0, i)),
        compiler_params=pltpu.CompilerParams(
            dimension_semantics=("parallel",),          # megacore sharding on v7x
            vmem_limit_bytes=32 * 1024 * 1024,          # plenty even at bt=2048
        ),
    )(
        stu, exer, kp, edisc, kemb_p,
        w1_p, b1.astype(jnp.float32).reshape(L1, 1),
        w2_abs, b2.astype(jnp.float32).reshape(L2, 1),
        w3_abs, b3.astype(jnp.float32).reshape(1, 1),
    )
    return out.reshape(-1)[:B]


def _xavier_normal(key, shape):
    # shape = (fan_out, fan_in), like a torch Linear / Embedding weight matrix.
    fan_out, fan_in = shape
    std = (2.0 / (fan_in + fan_out)) ** 0.5
    return std * jax.random.normal(key, shape, dtype=jnp.float32)


def make_params(key, exer_n, student_n, knowledge_n, dim):
    len1, len2 = 256, 128
    ks = jax.random.split(key, 10)
    return {
        # Row-major embedding tables: (rows, features) -> contiguous row gathers.
        "student_emb": _xavier_normal(ks[0], (student_n, dim)),
        "exercise_emb": _xavier_normal(ks[1], (exer_n, dim)),
        "e_discrimination": _xavier_normal(ks[2], (exer_n, 1)),
        "knowledge_emb": _xavier_normal(ks[3], (knowledge_n, dim)),
        # PosLinear weights kept in torch (out_features, in_features) layout.
        "w1": _xavier_normal(ks[4], (len1, knowledge_n)),
        "b1": 0.01 * jax.random.normal(ks[5], (len1,), dtype=jnp.float32),
        "w2": _xavier_normal(ks[6], (len2, len1)),
        "b2": 0.01 * jax.random.normal(ks[7], (len2,), dtype=jnp.float32),
        "w3": _xavier_normal(ks[8], (1, len2)),
        "b3": 0.01 * jax.random.normal(ks[9], (1,), dtype=jnp.float32),
    }


def reference_forward(params, stu_id, input_exercise, input_knowledge_point):
    """Plain-JAX mirror of Net.forward (mf_type='mf') for correctness checking."""
    stu = params["student_emb"][stu_id]                             # (B, D)
    exer = params["exercise_emb"][input_exercise]                   # (B, D)
    kemb = params["knowledge_emb"]                                  # (K, D)
    stat = jax.nn.sigmoid(stu @ kemb.T)                             # (B, K)
    kdiff = jax.nn.sigmoid(exer @ kemb.T)                           # (B, K)
    edisc = jax.nn.sigmoid(params["e_discrimination"][input_exercise])  # (B, 1)
    x = edisc * (stat - kdiff) * input_knowledge_point
    h1 = jnp.tanh(x @ jnp.abs(params["w1"]).T + params["b1"])
    h2 = jnp.tanh(h1 @ jnp.abs(params["w2"]).T + params["b2"])
    return jax.nn.sigmoid(h2 @ jnp.abs(params["w3"]).T + params["b3"]).reshape(-1)


if __name__ == "__main__":
    # Small, forward-consistent sizes.
    exer_n, student_n, knowledge_n, dim = 30, 20, 32, 16
    batch = 8

    key = jax.random.PRNGKey(0)
    k_params, k_stu, k_exer, k_kp = jax.random.split(key, 4)

    params = make_params(k_params, exer_n, student_n, knowledge_n, dim)

    stu_id = jax.random.randint(k_stu, (batch,), 0, student_n)
    input_exercise = jax.random.randint(k_exer, (batch,), 0, exer_n)
    input_knowledge_point = (
        jax.random.uniform(k_kp, (batch, knowledge_n)) < 0.3
    ).astype(jnp.float32)

    cdt = _default_compute_dtype()                    # bf16 on v6e/v7x, f32 on v5e
    out = kancd_forward(params, stu_id, input_exercise, input_knowledge_point,
                        compute_dtype=cdt)
    out = jax.block_until_ready(out)

    assert out.shape == (batch,)
    assert bool(jnp.all(jnp.isfinite(out)))

    ref = reference_forward(params, stu_id, input_exercise, input_knowledge_point)
    tol = 1e-2 if cdt == jnp.float32 else 5e-2
    max_err = float(jnp.max(jnp.abs(out - ref)))
    assert max_err < tol, f"kernel/reference mismatch: {max_err} (tol {tol})"

    print("KERNEL_OK")
</pallas_src>

<mosaic_0001>
module attributes {stable_mosaic.version = 11 : i64} {
  func.func @kancd_kernel(%arg0: i32, %arg1: memref<128x16xf32, #tpu.memory_space<vmem>>, %arg2: memref<128x16xf32, #tpu.memory_space<vmem>>, %arg3: memref<128x32xf32, #tpu.memory_space<vmem>>, %arg4: memref<128x1xf32, #tpu.memory_space<vmem>>, %arg5: memref<32x16xf32, #tpu.memory_space<vmem>>, %arg6: memref<256x32xf32, #tpu.memory_space<vmem>>, %arg7: memref<256x1xf32, #tpu.memory_space<vmem>>, %arg8: memref<128x256xf32, #tpu.memory_space<vmem>>, %arg9: memref<128x1xf32, #tpu.memory_space<vmem>>, %arg10: memref<128x1xf32, #tpu.memory_space<vmem>>, %arg11: memref<1x1xf32, #tpu.memory_space<vmem>>, %arg12: memref<1x128xf32, #tpu.memory_space<vmem>>) attributes {dimension_semantics = [#tpu.dimension_semantics<parallel>], iteration_bounds = array<i64: 1>, scalar_prefetch = 0 : i64, scratch_operands = 0 : i64, tpu.core_type = #tpu.core_type<tc>, window_params = [{transform_indices = @transform_0, window_bounds = array<i64: 128, 16>}, {transform_indices = @transform_1, window_bounds = array<i64: 128, 16>}, {transform_indices = @transform_2, window_bounds = array<i64: 128, 32>}, {transform_indices = @transform_3, window_bounds = array<i64: 128, 1>}, {pipeline_mode = #tpu.pipeline_mode<synchronous>, transform_indices = @transform_4, window_bounds = array<i64: 32, 16>}, {pipeline_mode = #tpu.pipeline_mode<synchronous>, transform_indices = @transform_5, window_bounds = array<i64: 256, 32>}, {pipeline_mode = #tpu.pipeline_mode<synchronous>, transform_indices = @transform_6, window_bounds = array<i64: 256, 1>}, {pipeline_mode = #tpu.pipeline_mode<synchronous>, transform_indices = @transform_7, window_bounds = array<i64: 128, 256>}, {pipeline_mode = #tpu.pipeline_mode<synchronous>, transform_indices = @transform_8, window_bounds = array<i64: 128, 1>}, {pipeline_mode = #tpu.pipeline_mode<synchronous>, transform_indices = @transform_9, window_bounds = array<i64: 128, 1>}, {pipeline_mode = #tpu.pipeline_mode<synchronous>, transform_indices = @transform_10, window_bounds = array<i64: 1, 1>}, {transform_indices = @transform_11, window_bounds = array<i64: 1, 128>}]} {
    %c0 = arith.constant 0 : index
    %c0_0 = arith.constant 0 : index
    %0 = vector.load %arg5[%c0, %c0_0] : memref<32x16xf32, #tpu.memory_space<vmem>>, vector<32x16xf32>
    %c0_1 = arith.constant 0 : index
    %c0_2 = arith.constant 0 : index
    %1 = vector.load %arg1[%c0_1, %c0_2] : memref<128x16xf32, #tpu.memory_space<vmem>>, vector<128x16xf32>
    %cst = arith.constant dense<0.000000e+00> : vector<128x32xf32>
    %2 = tpu.matmul %1, %0, %cst {dimension_numbers = #tpu.dot_dimension_numbers<[1], [1], [0], [0], [0, 0, 1, 0], [], []>} : vector<128x16xf32>, vector<32x16xf32>, vector<128x32xf32> -> vector<128x32xf32>
    %3 = arith.negf %2 : vector<128x32xf32>
    %4 = math.exp %3 : vector<128x32xf32>
    %cst_3 = arith.constant 1.000000e+00 : f32
    %5 = vector.broadcast %cst_3 : f32 to vector<128x32xf32>
    %6 = arith.addf %5, %4 : vector<128x32xf32>
    %7 = arith.divf %5, %6 : vector<128x32xf32>
    %c0_4 = arith.constant 0 : index
    %c0_5 = arith.constant 0 : index
    %8 = vector.load %arg2[%c0_4, %c0_5] : memref<128x16xf32, #tpu.memory_space<vmem>>, vector<128x16xf32>
    %cst_6 = arith.constant dense<0.000000e+00> : vector<128x32xf32>
    %9 = tpu.matmul %8, %0, %cst_6 {dimension_numbers = #tpu.dot_dimension_numbers<[1], [1], [0], [0], [0, 0, 1, 0], [], []>} : vector<128x16xf32>, vector<32x16xf32>, vector<128x32xf32> -> vector<128x32xf32>
    %10 = arith.negf %9 : vector<128x32xf32>
    %11 = math.exp %10 : vector<128x32xf32>
    %cst_7 = arith.constant 1.000000e+00 : f32
    %12 = vector.broadcast %cst_7 : f32 to vector<128x32xf32>
    %13 = arith.addf %12, %11 : vector<128x32xf32>
    %14 = arith.divf %12, %13 : vector<128x32xf32>
    %c0_8 = arith.constant 0 : index
    %c0_9 = arith.constant 0 : index
    %15 = vector.load %arg4[%c0_8, %c0_9] : memref<128x1xf32, #tpu.memory_space<vmem>>, vector<128x1xf32>
    %16 = arith.negf %15 : vector<128x1xf32>
    %17 = math.exp %16 : vector<128x1xf32>
    %cst_10 = arith.constant 1.000000e+00 : f32
    %18 = vector.broadcast %cst_10 : f32 to vector<128x1xf32>
    %19 = arith.addf %18, %17 : vector<128x1xf32>
    %20 = arith.divf %18, %19 : vector<128x1xf32>
    %21 = arith.subf %7, %14 : vector<128x32xf32>
    %22 = vector.broadcast %20 : vector<128x1xf32> to vector<128x32xf32>
    %23 = arith.mulf %22, %21 : vector<128x32xf32>
    %c0_11 = arith.constant 0 : index
    %c0_12 = arith.constant 0 : index
    %24 = vector.load %arg3[%c0_11, %c0_12] : memref<128x32xf32, #tpu.memory_space<vmem>>, vector<128x32xf32>
    %25 = arith.mulf %23, %24 : vector<128x32xf32>
    %c0_13 = arith.constant 0 : index
    %c0_14 = arith.constant 0 : index
    %26 = vector.load %arg6[%c0_13, %c0_14] : memref<256x32xf32, #tpu.memory_space<vmem>>, vector<256x32xf32>
    %cst_15 = arith.constant dense<0.000000e+00> : vector<256x128xf32>
    %27 = tpu.matmul %26, %25, %cst_15 {dimension_numbers = #tpu.dot_dimension_numbers<[1], [1], [0], [0], [0, 0, 1, 0], [], []>} : vector<256x32xf32>, vector<128x32xf32>, vector<256x128xf32> -> vector<256x128xf32>
    %c0_16 = arith.constant 0 : index
    %c0_17 = arith.constant 0 : index
    %28 = vector.load %arg7[%c0_16, %c0_17] : memref<256x1xf32, #tpu.memory_space<vmem>>, vector<256x1xf32>
    %29 = vector.broadcast %28 : vector<256x1xf32> to vector<256x128xf32>
    %30 = arith.addf %27, %29 : vector<256x128xf32>
    %31 = math.tanh %30 : vector<256x128xf32>
    %c0_18 = arith.constant 0 : index
    %c0_19 = arith.constant 0 : index
    %32 = vector.load %arg8[%c0_18, %c0_19] : memref<128x256xf32, #tpu.memory_space<vmem>>, vector<128x256xf32>
    %cst_20 = arith.constant dense<0.000000e+00> : vector<128x128xf32>
    %33 = tpu.matmul %32, %31, %cst_20 {dimension_numbers = #tpu.dot_dimension_numbers<[1], [0], [0], [1], [0, 0, 1, 1], [], []>} : vector<128x256xf32>, vector<256x128xf32>, vector<128x128xf32> -> vector<128x128xf32>
    %c0_21 = arith.constant 0 : index
    %c0_22 = arith.constant 0 : index
    %34 = vector.load %arg9[%c0_21, %c0_22] : memref<128x1xf32, #tpu.memory_space<vmem>>, vector<128x1xf32>
    %35 = vector.broadcast %34 : vector<128x1xf32> to vector<128x128xf32>
    %36 = arith.addf %33, %35 : vector<128x128xf32>
    %37 = math.tanh %36 : vector<128x128xf32>
    %c0_23 = arith.constant 0 : index
    %c0_24 = arith.constant 0 : index
    %38 = vector.load %arg10[%c0_23, %c0_24] : memref<128x1xf32, #tpu.memory_space<vmem>>, vector<128x1xf32>
    %39 = vector.broadcast %38 : vector<128x1xf32> to vector<128x128xf32>
    %40 = arith.mulf %37, %39 : vector<128x128xf32>
    %cst_25 = arith.constant dense<0.000000e+00> : vector<128xf32>
    %41 = vector.multi_reduction <add>, %40, %cst_25 [0] : vector<128x128xf32> to vector<128xf32>
    %42 = vector.shape_cast %41 : vector<128xf32> to vector<1x128xf32>
    %c0_26 = arith.constant 0 : index
    %c0_27 = arith.constant 0 : index
    %43 = vector.load %arg11[%c0_26, %c0_27] : memref<1x1xf32, #tpu.memory_space<vmem>>, vector<1x1xf32>
    %44 = vector.broadcast %43 : vector<1x1xf32> to vector<1x128xf32>
    %45 = arith.addf %42, %44 : vector<1x128xf32>
    %46 = arith.negf %45 : vector<1x128xf32>
    %47 = math.exp %46 : vector<1x128xf32>
    %cst_28 = arith.constant 1.000000e+00 : f32
    %48 = vector.broadcast %cst_28 : f32 to vector<1x128xf32>
    %49 = arith.addf %48, %47 : vector<1x128xf32>
    %50 = arith.divf %48, %49 : vector<1x128xf32>
    %c0_29 = arith.constant 0 : index
    %c0_30 = arith.constant 0 : index
    %51 = vector.load %arg12[%c0_29, %c0_30] : memref<1x128xf32, #tpu.memory_space<vmem>>, vector<1x128xf32>
    tpu.vector_store %arg12[%c0_29, %c0_30], %50 {strides = array<i32>} : memref<1x128xf32, #tpu.memory_space<vmem>>, vector<1x128xf32>,
    return
  }
  func.func @transform_0(%arg0: i32) -> (i32, i32) {
    %c0_i32 = arith.constant 0 : i32
    %c0_i32_0 = arith.constant 0 : i32
    return %arg0, %c0_i32 : i32, i32
  }
  func.func @transform_1(%arg0: i32) -> (i32, i32) {
    %c0_i32 = arith.constant 0 : i32
    %c0_i32_0 = arith.constant 0 : i32
    return %arg0, %c0_i32 : i32, i32
  }
  func.func @transform_2(%arg0: i32) -> (i32, i32) {
    %c0_i32 = arith.constant 0 : i32
    %c0_i32_0 = arith.constant 0 : i32
    return %arg0, %c0_i32 : i32, i32
  }
  func.func @transform_3(%arg0: i32) -> (i32, i32) {
    %c0_i32 = arith.constant 0 : i32
    %c0_i32_0 = arith.constant 0 : i32
    return %arg0, %c0_i32 : i32, i32
  }
  func.func @transform_4(%arg0: i32) -> (i32, i32) {
    %c0_i32 = arith.constant 0 : i32
    %c0_i32_0 = arith.constant 0 : i32
    %c0_i32_1 = arith.constant 0 : i32
    return %c0_i32, %c0_i32_0 : i32, i32
  }
  func.func @transform_5(%arg0: i32) -> (i32, i32) {
    %c0_i32 = arith.constant 0 : i32
    %c0_i32_0 = arith.constant 0 : i32
    %c0_i32_1 = arith.constant 0 : i32
    return %c0_i32, %c0_i32_0 : i32, i32
  }
  func.func @transform_6(%arg0: i32) -> (i32, i32) {
    %c0_i32 = arith.constant 0 : i32
    %c0_i32_0 = arith.constant 0 : i32
    %c0_i32_1 = arith.constant 0 : i32
    return %c0_i32, %c0_i32_0 : i32, i32
  }
  func.func @transform_7(%arg0: i32) -> (i32, i32) {
    %c0_i32 = arith.constant 0 : i32
    %c0_i32_0 = arith.constant 0 : i32
    %c0_i32_1 = arith.constant 0 : i32
    return %c0_i32, %c0_i32_0 : i32, i32
  }
  func.func @transform_8(%arg0: i32) -> (i32, i32) {
    %c0_i32 = arith.constant 0 : i32
    %c0_i32_0 = arith.constant 0 : i32
    %c0_i32_1 = arith.constant 0 : i32
    return %c0_i32, %c0_i32_0 : i32, i32
  }
  func.func @transform_9(%arg0: i32) -> (i32, i32) {
    %c0_i32 = arith.constant 0 : i32
    %c0_i32_0 = arith.constant 0 : i32
    %c0_i32_1 = arith.constant 0 : i32
    return %c0_i32, %c0_i32_0 : i32, i32
  }
  func.func @transform_10(%arg0: i32) -> (i32, i32) {
    %c0_i32 = arith.constant 0 : i32
    %c0_i32_0 = arith.constant 0 : i32
    %c0_i32_1 = arith.constant 0 : i32
    return %c0_i32, %c0_i32_0 : i32, i32
  }
  func.func @transform_11(%arg0: i32) -> (i32, i32) {
    %c0_i32 = arith.constant 0 : i32
    %c0_i32_0 = arith.constant 0 : i32
    return %c0_i32, %arg0 : i32, i32
  }
}

</mosaic_0001>

<bundles_post_ra>
// kernel: kancd_forward.1
= control target key start
LH: loop header
LB: loop body
LE: loop exit
PB: predicated region body
PF: predicated region fallthrough
CT: control target
= control target key end

     0   :  { %vm60_vm0 = vcmask 130048   ;;  %v2793_v1 = vmov 0   ;;  %s4953_s4 = inlined_call_operand.vmem [shape: f32[32,16], index: 4, kind: input, shape index: {}]   ;;  %s4954_s3 = inlined_call_operand.vmem [shape: f32[128,1], index: 3, kind: input, shape index: {}]   ;;  %s4955_s0 = inlined_call_operand.vmem [shape: f32[128,16], index: 0, kind: input, shape index: {}]   ;;  %s4956_s1 = inlined_call_operand.vmem [shape: f32[128,16], index: 1, kind: input, shape index: {}]   ;;  %s4957_s6 = inlined_call_operand.vmem [shape: f32[256,1], index: 6, kind: input, shape index: {}]   ;;  %s4958_s8 = inlined_call_operand.vmem [shape: f32[128,1], index: 8, kind: input, shape index: {}]   ;;  %s4959_s9 = inlined_call_operand.vmem [shape: f32[128,1], index: 9, kind: input, shape index: {}]   ;;  %s4960_s10 = inlined_call_operand.<no memory space> [shape: f32[1,1], index: 10, kind: input, shape index: {}]   ;;  %s4961_s2 = inlined_call_operand.vmem [shape: f32[128,32], index: 2, kind: input, shape index: {}]   ;;  %s4962_s5 = inlined_call_operand.vmem [shape: f32[256,32], index: 5, kind: input, shape index: {}]   ;;  %s4963_s7 = inlined_call_operand.vmem [shape: f32[128,256], index: 7, kind: input, shape index: {}]   ;;  %s4964_s11 = inlined_call_operand.vmem [shape: f32[1,128], index: 11, kind: output, shape index: {}]  }
   0x1   :  { %v43_v0 = vld [vmem:[%s4953_s4 + $0x18] sm:$0xff]  ;;  %2500 = vset.pattern.permute.xlu2 %v2793_v1  ;;  %2499 = vset.pattern.permute.xlu1 %v2793_v1  ;;  %v42_v2 = vld [vmem:[%s4953_s4 + $0x10] sm:$0xff]  ;;  %v936_v5 = vld [vmem:[%s4954_s3 + $0x68] sm:$0xff] }
   0x2   :  { %2340 = vmatpush.xpose.msk.msra.mxu0 %vm60_vm0, %v43_v0  ;;  %2376 = vmatpush.xpose.msk.msra.mxu1 %vm60_vm0, %v43_v0  ;;  %v938_v3 = vld [vmem:[%s4954_s3 + $0x78] sm:$0xff]  ;;  %v2425_v7 = vmul.f32 -1.442695, %v936_v5  ;;  %v937_v9 = vld [vmem:[%s4954_s3 + $0x70] sm:$0xff]  ;;  %v935_v11 = vld [vmem:[%s4954_s3 + $0x60] sm:$0xff] }
   0x3   :  { %2498 = vset.pattern.permute.xlu0 %v2793_v1  ;;  %2477 = vmatpush.xpose.msk.msra.mxu3 %vm60_vm0, %v43_v0  ;;  %v2427_v4 = vmul.f32 -1.442695, %v938_v3  ;;  %v934_v6 = vld [vmem:[%s4954_s3 + $0x58] sm:$0xff]  ;;  %v2426_v10 = vmul.f32 -1.442695, %v937_v9  ;;  %v933_v12 = vld [vmem:[%s4954_s3 + $0x50] sm:$0xff] }
   0x4   :  { %v2423_v8 = vmul.f32 -1.442695, %v934_v6  ;;  %v932_v13 = vld [vmem:[%s4954_s3 + $0x48] sm:$0xff]  ;;  %v2424_v15 = vmul.f32 -1.442695, %v935_v11  ;;  %v931_v17 = vld [vmem:[%s4954_s3 + $0x40] sm:$0xff] }
   0x5   :  { %2501 = vpow2.f32 %v2427_v4  ;;  %v41_v14 = vld [vmem:[%s4953_s4 + $0x8] sm:$0xff]  ;;  %v2422_v16 = vmul.f32 -1.442695, %v933_v12  ;;  %v2421_v18 = vmul.f32 -1.442695, %v932_v13  ;;  %v40_v20 = vld [vmem:[%s4953_s4] sm:$0xff] }
   0x6   :  { %2341 = vmatpush.xpose.msk.msra.mxu0 %vm60_vm0, %v42_v2  ;;  %2377 = vmatpush.xpose.msk.msra.mxu1 %vm60_vm0, %v42_v2  ;;  %2503 = vpow2.f32 %v2425_v7  ;;  %v2420_v19 = vmul.f32 -1.442695, %v931_v17  ;;  %v930_v21 = vld [vmem:[%s4954_s3 + $0x38] sm:$0xff]  ;;  %v44_v26 = vld [vmem:[%s4955_s0] sm:$0xff]  ;;  %v929_v31 = vld [vmem:[%s4954_s3 + $0x30] sm:$0xff] }
   0x7   :  { %2478 = vmatpush.xpose.msk.msra.mxu3 %vm60_vm0, %v42_v2  ;;  %2505 = vpow2.f32 %v2423_v8  ;;  %v490_v27 = vld [vmem:[%s4956_s1] sm:$0xff]  ;;  %v2419_v29 = vmul.f32 -1.442695, %v930_v21  ;;  %v2932_v41 = vmul.f32 -1.442695, %v929_v31  ;;  %v45_v53 = vld [vmem:[%s4955_s0 + $0x8] sm:$0xff] }
   0x8   :  { %2507 = vpow2.f32 %v2426_v10  ;;  %v491_v54 = vld [vmem:[%s4956_s1 + $0x8] sm:$0xff] }
   0x9   :  { %2509 = vpow2.f32 %v2424_v15  ;;  %v924_v7 = vld [vmem:[%s4954_s3 + $0x8] sm:$0xff] }
   0xa   :  { %2342 = vmatpush.xpose.msk.msra.mxu0 %vm60_vm0, %v41_v14  ;;  %2378 = vmatpush.xpose.msk.msra.mxu1 %vm60_vm0, %v41_v14  ;;  %2511 = vpow2.f32 %v2422_v16  ;;  %v2413_v15 = vmul.f32 -1.442695, %v924_v7 }
   0xb   :  { %2479 = vmatpush.xpose.msk.msra.mxu3 %vm60_vm0, %v41_v14  ;;  %v2502_v22 = vpop.eup %2501  ;;  %2513 = vpow2.f32 %v2421_v18 }
   0xc   :  { %v2504_v23 = vpop.eup %2503  ;;  %v2902_v24 = vadd.f32 1.0, %v2502_v22  ;;  %2515 = vpow2.f32 %v2420_v19 }
   0xd   :  { %v2506_v25 = vpop.eup %2505  ;;  %v2912_v28 = vadd.f32 1.0, %v2504_v23 }
   0xe   :  { %2343 = vmatpush.xpose.msk.msra.mxu0 %vm60_vm0, %v40_v20  ;;  %2379 = vmatpush.xpose.msk.msra.mxu1 %vm60_vm0, %v40_v20  ;;  %v2508_v30 = vpop.eup %2507  ;;  %2517 = vrcp.f32 %v2902_v24  ;;  %v1237_v33 = vand.u32 2147483647, %v2902_v24  ;;  %v1239_v35 = vand.u32 2147483648, %v2902_v24  ;;  %v2925_v37 = vadd.f32 1.0, %v2506_v25 }
   0xf   :  { %2480 = vmatpush.xpose.msk.msra.mxu3 %vm60_vm0, %v40_v20  ;;  %v2510_v32 = vpop.eup %2509  ;;  %2519 = vrcp.f32 %v2912_v28  ;;  %v1207_v36 = vand.u32 2147483647, %v2912_v28  ;;  %v2927_v38 = vadd.f32 1.0, %v2508_v30  ;;  %v1209_v39 = vand.u32 2147483648, %v2912_v28  ;;  %v492_v30 = vld [vmem:[%s4956_s1 + $0x10] sm:$0xff] }
  0x10   :  { %v2512_v34 = vpop.eup %2511  ;;  %v2930_v40 = vadd.f32 1.0, %v2510_v32  ;;  %2521 = vpow2.f32 %v2419_v29  ;;  %vm1233_vm1 = vweird.f32 %v2902_v24  ;;  %vm1203_vm2 = vweird.f32 %v2912_v28 }
  0x11   :  { %2344 = vmatmul.msk.f32.vlgmr.msra.gmra.mxu0 %vm60_vm0, %v44_v26  ;;  %2380 = vmatmul.msk.f32.vlgmr.msra.gmra.mxu1 %vm60_vm0, %v490_v27  ;;  %v2514_v42 = vpop.eup %2513  ;;  %2523 = vrcp.f32 %v2925_v37  ;;  %v1179_v43 = vand.u32 2147483648, %v2925_v37  ;;  %vm2938_vm3 = vcmp.eq.f32.partialorder %v1237_v33, 8.507059e+37  ;;  %v1177_v46 = vand.u32 2147483647, %v2925_v37 }
  0x12   :  { %v2516_v44 = vpop.eup %2515  ;;  %2525 = vrcp.f32 %v2927_v38  ;;  %v2944_v47 = vadd.f32 1.0, %v2512_v34  ;;  %v1240_v49 = vor.u32 1.1754944e-38, %v1239_v35  ;;  %vm2946_vm4 = vcmp.eq.f32.partialorder %v1207_v36, 8.507059e+37 }
  0x13   :  { %v1224_v51 = vand.u32 2147483648, %v2927_v38  ;;  %2527 = vrcp.f32 %v2930_v40  ;;  %v1210_v56 = vor.u32 1.1754944e-38, %v1209_v39  ;;  %vm1173_vm5 = vweird.f32 %v2925_v37 }
  0x14   :  { %v2518_v48 = vpop.eup %2517  ;;  %v1222_v57 = vand.u32 2147483647, %v2927_v38  ;;  %v2962_v59 = vor.u32 1.1754944e-38, %v1179_v43  ;;  %vm1218_vm6 = vweird.f32 %v2927_v38  ;;  %v1192_v60 = vand.u32 2147483647, %v2930_v40 }
  0x15   :  { %v2520_v52 = vpop.eup %2519  ;;  %v1229_v55 = vmul.f32 %v2518_v48, %v2902_v24  ;;  %vm1234_vm7 = vweird.f32 %v2518_v48  ;;  %vm2966_vm8 = vcmp.eq.f32.partialorder %v1177_v46, 8.507059e+37  ;;  %vm1188_vm9 = vweird.f32 %v2930_v40  ;;  %v46_v24 = vld [vmem:[%s4955_s0 + $0x10] sm:$0xff] }
  0x16   :  { %v1199_v58 = vmul.f32 %v2520_v52, %v2912_v28  ;;  %v2522_v61 = vpop.eup %2521  ;;  %2529 = vrcp.f32 %v2944_v47  ;;  %vm1204_vm10 = vweird.f32 %v2520_v52  ;;  %v2974_v2 = vor.u32 1.1754944e-38, %v1224_v51  ;;  %vm2989_vm13 = vmor %vm1233_vm1, %vm1234_vm7  ;;  %v927_v51 = vld [vmem:[%s4954_s3 + $0x20] sm:$0xff] }
  0x17   :  { %v1230_v62 = vsub.f32 1.0, %v1229_v55  ;;  %v2524_v0 = vpop.eup %2523  ;;  %v1194_v3 = vand.u32 2147483648, %v2930_v40  ;;  %vm2980_vm11 = vcmp.eq.f32.partialorder %v1222_v57, 8.507059e+37  ;;  %v1162_v8 = vand.u32 2147483647, %v2944_v47  ;;  %vm3002_vm12 = vmor %vm1203_vm2, %vm1204_vm10 }
  0x18   :  { %v1200_v1 = vsub.f32 1.0, %v1199_v58  ;;  %v2977_v4 = vpop.eup %2525  ;;  %v1169_v6 = vmul.f32 %v2524_v0, %v2925_v37  ;;  %vm1174_vm14 = vweird.f32 %v2524_v0  ;;  %vm2995_vm15 = vcmp.eq.f32.partialorder %v1192_v60, 8.507059e+37 }
  0x19   :  { %2345 = vmatmul.msk.f32.gmra.mxu0 %vm60_vm0, %v45_v53  ;;  %2381 = vmatmul.msk.f32.gmra.mxu1 %vm60_vm0, %v491_v54  ;;  %v1231_v5 = vmul.f32 %v2518_v48, %v1230_v62  ;;  %v2528_v9 = vpop.eup %2527  ;;  %v1214_v12 = vmul.f32 %v2977_v4, %v2927_v38  ;;  %vm1219_vm1 = vweird.f32 %v2977_v4  ;;  %v3008_v20 = vadd.f32 1.0, %v2514_v42  ;;  %vm3026_vm2 = vmor %vm1173_vm5, %vm1174_vm14  ;;  %v47_v62 = vld [vmem:[%s4955_s0 + $0x18] sm:$0xff] }
  0x1a   :  { %v1201_v11 = vmul.f32 %v2520_v52, %v1200_v1  ;;  %v1170_v16 = vsub.f32 1.0, %v1169_v6  ;;  %v1184_v17 = vmul.f32 %v2528_v9, %v2930_v40  ;;  %vm1189_vm7 = vweird.f32 %v2528_v9  ;;  %v928_v40 = vld [vmem:[%s4954_s3 + $0x28] sm:$0xff]  ;;  %v925_v6 = vld [vmem:[%s4954_s3 + $0x10] sm:$0xff] }
  0x1b   :  { %v1232_v14 = vadd.f32 %v2518_v48, %v1231_v5  ;;  %v1215_v19 = vsub.f32 1.0, %v1214_v12  ;;  %v3017_v26 = vadd.f32 1.0, %v2516_v44  ;;  %v1164_v37 = vand.u32 2147483648, %v2944_v47 }
  0x1c   :  { %v1202_v18 = vadd.f32 %v2520_v52, %v1201_v11  ;;  %v3010_v21 = vpop.eup %2529  ;;  %v1171_v23 = vmul.f32 %v2524_v0, %v1170_v16  ;;  %v1185_v25 = vsub.f32 1.0, %v1184_v17  ;;  %2531 = vrcp.f32 %v3008_v20 }
  0x1d   :  { %v1236_v22 = vsel %vm2989_vm13, %v2518_v48, %v1232_v14  ;;  %v1216_v31 = vmul.f32 %v2977_v4, %v1215_v19  ;;  %v1154_v32 = vmul.f32 %v3010_v21, %v2944_v47  ;;  %vm1159_vm5 = vweird.f32 %v3010_v21  ;;  %v923_v19 = vld [vmem:[%s4954_s3] sm:$0xff] }
  0x1e   :  { %v1241_v27 = vsel %vm2938_vm3, %v1240_v49, %v1236_v22  ;;  %v1206_v28 = vsel %vm3002_vm12, %v2520_v52, %v1202_v18  ;;  %v1172_v34 = vadd.f32 %v2524_v0, %v1171_v23  ;;  %vm3042_vm3 = vmor %vm1218_vm6, %vm1219_vm1  ;;  %v1186_v36 = vmul.f32 %v2528_v9, %v1185_v25  ;;  %v1434_v22 = vld [vmem:[%s4957_s6 + $0x78] sm:$0xff] }
  0x1f   :  { %1336 = vperm.xlu0 %2498, %v1241_v27   ;;  %v1211_v33 = vsel %vm2946_vm4, %v1210_v56, %v1206_v28  ;;  %v1217_v39 = vadd.f32 %v2977_v4, %v1216_v31  ;;  %vm3052_vm4 = vmor %vm1188_vm9, %vm1189_vm7  ;;  %v1155_v38 = vsub.f32 1.0, %v1154_v32  ;;  %v1195_v45 = vor.u32 1.1754944e-38, %v1194_v3 }
  0x20   :  { %1326 = vperm.xlu1 %2499, %v1211_v33   ;;  %v1176_v43 = vsel %vm3026_vm2, %v2524_v0, %v1172_v34  ;;  %v1187_v44 = vadd.f32 %v2528_v9, %v1186_v36  ;;  %v3061_v46 = vadd.f32 1.0, %v2522_v61  ;;  %2533 = vrcp.f32 %v3017_v26  ;;  %v926_v0 = vld [vmem:[%s4954_s3 + $0x18] sm:$0xff]  ;;  %v494_v34 = vld [vmem:[%s4956_s1 + $0x20] sm:$0xff]  ;;  %v49_v61 = vld [vmem:[%s4955_s0 + $0x28] sm:$0xff] }
  0x21   :  { %2346 = vmatmul.msk.f32.gmra.mxu0 %vm60_vm0, %v46_v24  ;;  %2382 = vmatmul.msk.f32.gmra.mxu1 %vm60_vm0, %v492_v30  ;;  %v1181_v48 = vsel %vm2966_vm8, %v2962_v59, %v1176_v43  ;;  %v1221_v49 = vsel %vm3042_vm3, %v2977_v4, %v1217_v39  ;;  %v1156_v50 = vmul.f32 %v3010_v21, %v1155_v38  ;;  %vm5048_vm6 = vweird.f32 %v2944_v47  ;;  %v48_v30 = vld [vmem:[%s4955_s0 + $0x20] sm:$0xff] }
  0x22   :  { %1316 = vperm.xlu2 %2500, %v1181_v48   ;;  %v1191_v52 = vsel %vm3052_vm4, %v2528_v9, %v1187_v44  ;;  %vm3083_vm8 = vmor %vm5048_vm6, %vm1159_vm5  ;;  %v1147_v54 = vand.u32 2147483647, %v3008_v20  ;;  %v1149_v55 = vand.u32 2147483648, %v3008_v20  ;;  %v1226_v56 = vsel %vm2980_vm11, %v2974_v2, %v1221_v49  ;;  %v2532_v1 = vpop.eup %2531  ;;  %v493_v2 = vld [vmem:[%s4956_s1 + $0x18] sm:$0xff] }
  0x23   :  { %v1157_v57 = vadd.f32 %v3010_v21, %v1156_v50  ;;  %v1165_v58 = vor.u32 1.1754944e-38, %v1164_v37  ;;  %v2417_v59 = vmul.f32 -1.442695, %v928_v40  ;;  %v1196_v60 = vsel %vm2995_vm15, %v1195_v45, %v1191_v52 }
  0x24   :  { %vm3097_vm9 = vcmp.eq.f32.partialorder %v1162_v8, 8.507059e+37  ;;  %2535 = vrcp.f32 %v3061_v46  ;;  %v2416_v63 = vmul.f32 -1.442695, %v927_v51  ;;  %vm1143_vm10 = vweird.f32 %v3008_v20 }
  0x25   :  { %v1161_v47 = vsel %vm3083_vm8, %v3010_v21, %v1157_v57  ;;  %2537 = vpow2.f32 %v2932_v41  ;;  %v1139_v3 = vmul.f32 %v2532_v1, %v3008_v20  ;;  %vm3117_vm11 = vcmp.eq.f32.partialorder %v1147_v54, 8.507059e+37 }
  0x26   :  { %v1150_v5 = vor.u32 1.1754944e-38, %v1149_v55  ;;  %vm1128_vm12 = vweird.f32 %v3017_v26  ;;  %v2534_v8 = vpop.eup %2533  ;;  %v1166_v41 = vsel %vm3097_vm9, %v1165_v58, %v1161_v47  ;;  %v1134_v9 = vand.u32 2147483648, %v3017_v26 }
  0x27   :  { %1331 = vperm.xlu0 %2498, %v1226_v56   ;;  %2539 = vpow2.f32 %v2417_v59  ;;  %v2415_v10 = vmul.f32 -1.442695, %v926_v0  ;;  %v1140_v11 = vsub.f32 1.0, %v1139_v3  ;;  %vm1144_vm13 = vweird.f32 %v2532_v1 }
  0x28   :  { %1321 = vperm.xlu1 %2499, %v1196_v60   ;;  %v1124_v12 = vmul.f32 %v2534_v8, %v3017_v26  ;;  %2541 = vpow2.f32 %v2416_v63  ;;  %v1132_v13 = vand.u32 2147483647, %v3017_v26  ;;  %v2414_v14 = vmul.f32 -1.442695, %v925_v6  ;;  %vm3142_vm1 = vmor %vm1143_vm10, %vm1144_vm13  ;;  %v495_v63 = vld [vmem:[%s4956_s1 + $0x28] sm:$0xff] }
  0x29   :  { %2347 = vmatmul.msk.f32.gmra.mxu0 %vm60_vm0, %v47_v62  ;;  %2383 = vmatmul.msk.f32.gmra.mxu1 %vm60_vm0, %v493_v2  ;;  %2543 = vpow2.f32 %v2415_v10  ;;  %v1141_v17 = vmul.f32 %v2532_v1, %v1140_v11  ;;  %vm1129_vm14 = vweird.f32 %v2534_v8  ;;  %vm1113_vm15 = vweird.f32 %v3061_v46 }
  0x2a   :  { %v2536_v16 = vpop.eup %2535  ;;  %1311 = vperm.xlu2 %2500, %v1166_v41   ;;  %v1125_v18 = vsub.f32 1.0, %v1124_v12  ;;  %v1135_v23 = vor.u32 1.1754944e-38, %v1134_v9  ;;  %v1117_v25 = vand.u32 2147483647, %v3061_v46  ;;  %v1119_v27 = vand.u32 2147483648, %v3061_v46  ;;  %vm3157_vm7 = vmor %vm1128_vm12, %vm1129_vm14 }
  0x2b   :  { %v2538_v21 = vpop.eup %2537  ;;  %v1109_v24 = vmul.f32 %v2536_v16, %v3061_v46  ;;  %v1142_v28 = vadd.f32 %v2532_v1, %v1141_v17  ;;  %2545 = vpow2.f32 %v2414_v14  ;;  %vm1114_vm2 = vweird.f32 %v2536_v16 }
  0x2c   :  { %v1126_v29 = vmul.f32 %v2534_v8, %v1125_v18  ;;  %v3152_v31 = vadd.f32 1.0, %v2538_v21  ;;  %2547 = vpow2.f32 %v2413_v15  ;;  %v2412_v35 = vmul.f32 -1.442695, %v923_v19  ;;  %vm3179_vm5 = vmor %vm1113_vm15, %vm1114_vm2 }
  0x2d   :  { %v2540_v20 = vpop.eup %2539  ;;  %v1110_v33 = vsub.f32 1.0, %v1109_v24  ;;  %v1146_v37 = vsel %vm3142_vm1, %v2532_v1, %v1142_v28  ;;  %vm1133_vm3 = vcmp.eq.f32.partialorder %v1132_v13, 8.507059e+37  ;;  %vm3169_vm4 = vcmp.eq.f32.partialorder %v1117_v25, 8.507059e+37  ;;  %v50_v24 = vld [vmem:[%s4955_s0 + $0x30] sm:$0xff] }
  0x2e   :  { %v2542_v36 = vpop.eup %2541  ;;  %v1127_v39 = vadd.f32 %v2534_v8, %v1126_v29  ;;  %2549 = vrcp.f32 %v3152_v31  ;;  %v1151_v42 = vsel %vm3117_vm11, %v1150_v5, %v1146_v37  ;;  %v1120_v40 = vor.u32 1.1754944e-38, %v1119_v27  ;;  %v54_v25 = vld [vmem:[%s4955_s0 + $0x50] sm:$0xff]  ;;  %v1428_v37 = vld [vmem:[%s4957_s6 + $0x48] sm:$0xff] }
  0x2f   :  { %v2544_v26 = vpop.eup %2543  ;;  %v1111_v38 = vmul.f32 %v2536_v16, %v1110_v33  ;;  %1306 = vperm.xlu0 %2498, %v1151_v42   ;;  %v3184_v48 = vadd.f32 1.0, %v2540_v20  ;;  %v3186_v49 = vadd.f32 1.0, %v2542_v36  ;;  %2551 = vpow2.f32 %v2412_v35  ;;  %2354 = vmatmul.msk.f32.vlgmr.msra.gmra.mxu3 %vm60_vm0, %v54_v25  ;;  %v1433_v25 = vld [vmem:[%s4957_s6 + $0x70] sm:$0xff]  ;;  %v501_v36 = vld [vmem:[%s4956_s1 + $0x58] sm:$0xff] }
  0x30   :  { %v1131_v44 = vsel %vm3157_vm7, %v2534_v8, %v1127_v39  ;;  %v3188_v52 = vadd.f32 1.0, %v2544_v26  ;;  %v1102_v46 = vand.u32 2147483647, %v3152_v31  ;;  %v1104_v54 = vand.u32 2147483648, %v3152_v31  ;;  %v500_v20 = vld [vmem:[%s4956_s1 + $0x50] sm:$0xff] }
  0x31   :  { %2348 = vmatmul.msk.f32.gmra.mxu0 %vm60_vm0, %v48_v30  ;;  %2384 = vmatmul.msk.f32.gmra.mxu1 %vm60_vm0, %v494_v34  ;;  %v1136_v50 = vsel %vm1133_vm3, %v1135_v23, %v1131_v44  ;;  %v1112_v51 = vadd.f32 %v2536_v16, %v1111_v38  ;;  %v2546_v53 = vpop.eup %2545  ;;  %2553 = vrcp.f32 %v3184_v48  ;;  %v1087_v59 = vand.u32 2147483647, %v3184_v48  ;;  %v496_v30 = vld [vmem:[%s4956_s1 + $0x30] sm:$0xff] }
  0x32   :  { %1301 = vperm.xlu1 %2499, %v1136_v50   ;;  %v2548_v55 = vpop.eup %2547  ;;  %2555 = vrcp.f32 %v3186_v49  ;;  %v1089_v60 = vand.u32 2147483648, %v3184_v48  ;;  %vm1098_vm6 = vweird.f32 %v3152_v31  ;;  %vm3209_vm8 = vcmp.eq.f32.partialorder %v1102_v46, 8.507059e+37 }
  0x33   :  { %v1116_v56 = vsel %vm3179_vm5, %v2536_v16, %v1112_v51  ;;  %2557 = vrcp.f32 %v3188_v52  ;;  %v1105_v1 = vor.u32 1.1754944e-38, %v1104_v54  ;;  %vm1083_vm9 = vweird.f32 %v3184_v48 }
  0x34   :  { %v2550_v57 = vpop.eup %2549  ;;  %v1121_v58 = vsel %vm3169_vm4, %v1120_v40, %v1116_v56  ;;  %v3215_v3 = vadd.f32 1.0, %v2546_v53  ;;  %v3217_v4 = vadd.f32 1.0, %v2548_v55  ;;  %vm3219_vm11 = vcmp.eq.f32.partialorder %v1087_v59, 8.507059e+37  ;;  %v55_v59 = vld [vmem:[%s4955_s0 + $0x58] sm:$0xff]  ;;  %v1425_v40 = vld [vmem:[%s4957_s6 + $0x30] sm:$0xff] }
  0x35   :  { %1296 = vperm.xlu2 %2500, %v1121_v58   ;;  %v1094_v62 = vmul.f32 %v2550_v57, %v3152_v31  ;;  %v2552_v47 = vpop.eup %2551  ;;  %vm1099_vm10 = vweird.f32 %v2550_v57  ;;  %v1090_v7 = vor.u32 1.1754944e-38, %v1089_v60  ;;  %vm1068_vm12 = vweird.f32 %v3186_v49  ;;  %v51_v58 = vld [vmem:[%s4955_s0 + $0x38] sm:$0xff] }
  0x36   :  { %v1072_v8 = vand.u32 2147483647, %v3186_v49  ;;  %v1074_v11 = vand.u32 2147483648, %v3186_v49  ;;  %2559 = vrcp.f32 %v3215_v3  ;;  %vm3232_vm13 = vmor %vm1098_vm6, %vm1099_vm10  ;;  %v1057_v14 = vand.u32 2147483647, %v3188_v52 }
  0x37   :  { %v1095_v2 = vsub.f32 1.0, %v1094_v62  ;;  %v2554_v5 = vpop.eup %2553  ;;  %v1059_v15 = vand.u32 2147483648, %v3188_v52  ;;  %v3239_v16 = vadd.f32 1.0, %v2552_v47  ;;  %2561 = vrcp.f32 %v3217_v4  ;;  %2355 = vmatmul.msk.f32.gmra.mxu3 %vm60_vm0, %v55_v59  ;;  %v1441_v59 = vld [vmem:[%s4957_s6 + $0xb0] sm:$0xff] }
  0x38   :  { %v2556_v41 = vpop.eup %2555  ;;  %v1079_v10 = vmul.f32 %v2554_v5, %v3184_v48  ;;  %vm1084_vm14 = vweird.f32 %v2554_v5  ;;  %vm3242_vm1 = vcmp.eq.f32.partialorder %v1072_v8, 8.507059e+37  ;;  %v1075_v29 = vor.u32 1.1754944e-38, %v1074_v11 }
  0x39   :  { %2349 = vmatmul.msk.f32.gmra.mxu0 %vm60_vm0, %v49_v61  ;;  %2385 = vmatmul.msk.f32.gmra.mxu1 %vm60_vm0, %v495_v63  ;;  %v1096_v9 = vmul.f32 %v2550_v57, %v1095_v2  ;;  %v1064_v13 = vmul.f32 %v2556_v41, %v3186_v49  ;;  %v2558_v17 = vpop.eup %2557  ;;  %vm1069_vm15 = vweird.f32 %v2556_v41  ;;  %vm1053_vm7 = vweird.f32 %v3188_v52  ;;  %vm3265_vm2 = vmor %vm1083_vm9, %vm1084_vm14 }
  0x3a   :  { %v1080_v19 = vsub.f32 1.0, %v1079_v10  ;;  %v1049_v23 = vmul.f32 %v2558_v17, %v3188_v52  ;;  %vm1054_vm3 = vweird.f32 %v2558_v17  ;;  %vm3272_vm4 = vmor %vm1068_vm12, %vm1069_vm15  ;;  %vm3276_vm5 = vcmp.eq.f32.partialorder %v1057_v14, 8.507059e+37 }
  0x3b   :  { %v1097_v18 = vadd.f32 %v2550_v57, %v1096_v9  ;;  %v1065_v21 = vsub.f32 1.0, %v1064_v13  ;;  %v1060_v39 = vor.u32 1.1754944e-38, %v1059_v15  ;;  %2563 = vrcp.f32 %v3239_v16  ;;  %vm3290_vm6 = vmor %vm1053_vm7, %vm1054_vm3 }
  0x3c   :  { %v1081_v28 = vmul.f32 %v2554_v5, %v1080_v19  ;;  %v1050_v33 = vsub.f32 1.0, %v1049_v23  ;;  %v2560_v34 = vpop.eup %2559  ;;  %v1044_v43 = vand.u32 2147483648, %v3215_v3  ;;  %v1042_v48 = vand.u32 2147483647, %v3215_v3  ;;  %v53_v23 = vld [vmem:[%s4955_s0 + $0x48] sm:$0xff] }
  0x3d   :  { %v1101_v27 = vsel %vm3232_vm13, %v2550_v57, %v1097_v18  ;;  %v1066_v32 = vmul.f32 %v2556_v41, %v1065_v21  ;;  %v1034_v38 = vmul.f32 %v2560_v34, %v3215_v3  ;;  %v2562_v44 = vpop.eup %2561  ;;  %vm1039_vm9 = vweird.f32 %v2560_v34  ;;  %v498_v18 = vld [vmem:[%s4956_s1 + $0x40] sm:$0xff] }
  0x3e   :  { %v1106_v31 = vsel %vm3209_vm8, %v1105_v1, %v1101_v27  ;;  %v1082_v35 = vadd.f32 %v2554_v5, %v1081_v28  ;;  %v1051_v42 = vmul.f32 %v2558_v17, %v1050_v33  ;;  %vm1038_vm8 = vweird.f32 %v3215_v3  ;;  %v497_v1 = vld [vmem:[%s4956_s1 + $0x38] sm:$0xff]  ;;  %v1419_v21 = vld [vmem:[%s4957_s6] sm:$0xff]  ;;  %v499_v27 = vld [vmem:[%s4956_s1 + $0x48] sm:$0xff] }
  0x3f   :  { %1291 = vperm.xlu0 %2498, %v1106_v31   ;;  %v1067_v26 = vadd.f32 %v2556_v41, %v1066_v32  ;;  %v1035_v53 = vsub.f32 1.0, %v1034_v38  ;;  %v1019_v46 = vmul.f32 %v2562_v44, %v3217_v4  ;;  %v1029_v54 = vand.u32 2147483648, %v3217_v4  ;;  %v1432_v28 = vld [vmem:[%s4957_s6 + $0x68] sm:$0xff]  ;;  %v1430_v31 = vld [vmem:[%s4957_s6 + $0x58] sm:$0xff]  ;;  %v1429_v33 = vld [vmem:[%s4957_s6 + $0x50] sm:$0xff] }
  0x40   :  { %v1086_v45 = vsel %vm3265_vm2, %v2554_v5, %v1082_v35  ;;  %v1052_v51 = vadd.f32 %v2558_v17, %v1051_v42  ;;  %v1045_v57 = vor.u32 1.1754944e-38, %v1044_v43  ;;  %vm1023_vm10 = vweird.f32 %v3217_v4  ;;  %v1450_v32 = vld [vmem:[%s4957_s6 + $0xf8] sm:$0xff]  ;;  %v1449_v35 = vld [vmem:[%s4957_s6 + $0xf0] sm:$0xff]  ;;  %v502_v42 = vld [vmem:[%s4956_s1 + $0x60] sm:$0xff] }
  0x41   :  { %2350 = vmatmul.msk.f32.gmra.mxu0 %vm60_vm0, %v50_v24  ;;  %2386 = vmatmul.msk.f32.gmra.mxu1 %vm60_vm0, %v496_v30  ;;  %v1091_v49 = vsel %vm3219_vm11, %v1090_v7, %v1086_v45  ;;  %v1071_v50 = vsel %vm3272_vm4, %v2556_v41, %v1067_v26  ;;  %v1036_v56 = vmul.f32 %v2560_v34, %v1035_v53  ;;  %v2564_v60 = vpop.eup %2563  ;;  %vm3318_vm11 = vmor %vm1038_vm8, %vm1039_vm9  ;;  %v1020_v63 = vsub.f32 1.0, %v1019_v46  ;;  %v57_v24 = vld [vmem:[%s4955_s0 + $0x68] sm:$0xff]  ;;  %v58_v30 = vld [vmem:[%s4955_s0 + $0x70] sm:$0xff] }
  0x42   :  { %1286 = vperm.xlu1 %2499, %v1091_v49   ;;  %v1076_v52 = vsel %vm3242_vm1, %v1075_v29, %v1071_v50  ;;  %v1056_v55 = vsel %vm3290_vm6, %v2558_v17, %v1052_v51  ;;  %vm1024_vm12 = vweird.f32 %v2562_v44  ;;  %v1027_v0 = vand.u32 2147483647, %v3217_v4  ;;  %v52_v4 = vld [vmem:[%s4955_s0 + $0x40] sm:$0xff]  ;;  %v1426_v43 = vld [vmem:[%s4957_s6 + $0x38] sm:$0xff]  ;;  %v503_v45 = vld [vmem:[%s4956_s1 + $0x68] sm:$0xff] }
  0x43   :  { %1281 = vperm.xlu2 %2500, %v1076_v52   ;;  %v1061_v61 = vsel %vm3276_vm5, %v1060_v39, %v1056_v55  ;;  %v1037_v47 = vadd.f32 %v2560_v34, %v1036_v56  ;;  %vm1043_vm13 = vcmp.eq.f32.partialorder %v1042_v48, 8.507059e+37  ;;  %v1004_v2 = vmul.f32 %v2564_v60, %v3239_v16  ;;  %vm1025_vm15 = vmor %vm1023_vm10, %vm1024_vm12  ;;  %v56_v17 = vld [vmem:[%s4955_s0 + $0x60] sm:$0xff]  ;;  %v1448_v39 = vld [vmem:[%s4957_s6 + $0xe8] sm:$0xff] }
  0x44   :  { %v1021_v3 = vmul.f32 %v2562_v44, %v1020_v63  ;;  %v1030_v5 = vor.u32 1.1754944e-38, %v1029_v54  ;;  %vm1008_vm14 = vweird.f32 %v3239_v16  ;;  %v1014_v6 = vand.u32 2147483648, %v3239_v16  ;;  %2356 = vmatmul.msk.f32.gmra.mxu3 %vm60_vm0, %v56_v17  ;;  %v1431_v29 = vld [vmem:[%s4957_s6 + $0x60] sm:$0xff]  ;;  %v1445_v48 = vld [vmem:[%s4957_s6 + $0xd0] sm:$0xff]  ;;  %v1424_v49 = vld [vmem:[%s4957_s6 + $0x28] sm:$0xff] }
  0x45   :  { %v1041_v7 = vsel %vm3318_vm11, %v2560_v34, %v1037_v47  ;;  %v1005_v8 = vsub.f32 1.0, %v1004_v2  ;;  %vm1009_vm1 = vweird.f32 %v2564_v60  ;;  %v1012_v41 = vand.u32 2147483647, %v3239_v16  ;;  %v59_v34 = vld [vmem:[%s4955_s0 + $0x78] sm:$0xff]  ;;  %v1427_v26 = vld [vmem:[%s4957_s6 + $0x40] sm:$0xff]  ;;  %v504_v50 = vld [vmem:[%s4956_s1 + $0x70] sm:$0xff] }
  0x46   :  { %v1046_v9 = vsel %vm1043_vm13, %v1045_v57, %v1041_v7  ;;  %v1022_v10 = vadd.f32 %v2562_v44, %v1021_v3  ;;  %vm1028_vm7 = vcmp.eq.f32.partialorder %v1027_v0, 8.507059e+37  ;;  %vm1010_vm2 = vmor %vm1008_vm14, %vm1009_vm1  ;;  %v1015_v13 = vor.u32 1.1754944e-38, %v1014_v6  ;;  %v1447_v38 = vld [vmem:[%s4957_s6 + $0xe0] sm:$0xff]  ;;  %v1444_v51 = vld [vmem:[%s4957_s6 + $0xc8] sm:$0xff] }
  0x47   :  { %1276 = vperm.xlu0 %2498, %v1061_v61   ;;  %v1006_v11 = vmul.f32 %v2564_v60, %v1005_v8  ;;  %vm1013_vm3 = vcmp.eq.f32.partialorder %v1012_v41, 8.507059e+37  ;;  %v1423_v53 = vld [vmem:[%s4957_s6 + $0x20] sm:$0xff]  ;;  %v505_v46 = vld [vmem:[%s4956_s1 + $0x78] sm:$0xff]  ;;  %v1440_v63 = vld [vmem:[%s4957_s6 + $0xa8] sm:$0xff] }
  0x48   :  { %v1026_v12 = vsel %vm1025_vm15, %v2562_v44, %v1022_v10  ;;  %v1446_v44 = vld [vmem:[%s4957_s6 + $0xd8] sm:$0xff]  ;;  %v1443_v52 = vld [vmem:[%s4957_s6 + $0xc0] sm:$0xff]  ;;  %v1437_v2 = vld [vmem:[%s4957_s6 + $0x90] sm:$0xff] }
  0x49   :  { %2351 = vmatmul.msk.f32.gmra.mxu0 %vm60_vm0, %v51_v58  ;;  %2387 = vmatmul.msk.f32.gmra.mxu1 %vm60_vm0, %v497_v1  ;;  %v1031_v14 = vsel %vm1028_vm7, %v1030_v5, %v1026_v12  ;;  %v1007_v15 = vadd.f32 %v2564_v60, %v1006_v11  ;;  %v1422_v54 = vld [vmem:[%s4957_s6 + $0x18] sm:$0xff]  ;;  %v1421_v58 = vld [vmem:[%s4957_s6 + $0x10] sm:$0xff]  ;;  %v1439_v0 = vld [vmem:[%s4957_s6 + $0xa0] sm:$0xff] }
  0x4a   :  { %1271 = vperm.xlu1 %2499, %v1046_v9   ;;  %v1442_v55 = vld [vmem:[%s4957_s6 + $0xb8] sm:$0xff]  ;;  %v1436_v5 = vld [vmem:[%s4957_s6 + $0x88] sm:$0xff]  ;;  %v1435_v6 = vld [vmem:[%s4957_s6 + $0x80] sm:$0xff] }
  0x4b   :  { %1266 = vperm.xlu2 %2500, %v1031_v14   ;;  %v1011_v16 = vsel %vm1010_vm2, %v2564_v60, %v1007_v15  ;;  %v1420_v60 = vld [vmem:[%s4957_s6 + $0x8] sm:$0xff]  ;;  %v1438_v1 = vld [vmem:[%s4957_s6 + $0x98] sm:$0xff]  ;;  %v1933_v8 = vld [vmem:[%s4958_s8] sm:$0xff] }
  0x4c   :  { %v1016_v19 = vsel %vm1013_vm3, %v1015_v13, %v1011_v16  ;;  %2357 = vmatmul.msk.f32.gmra.mxu3 %vm60_vm0, %v57_v24  ;;  %v1934_v9 = vld [vmem:[%s4958_s8 + $0x8] sm:$0xff]  ;;  %v1935_v10 = vld [vmem:[%s4958_s8 + $0x10] sm:$0xff]  ;;  %v1936_v11 = vld [vmem:[%s4958_s8 + $0x18] sm:$0xff] }
  0x4d   :  { %v1937_v14 = vld [vmem:[%s4958_s8 + $0x20] sm:$0xff]  ;;  %v1938_v15 = vld [vmem:[%s4958_s8 + $0x28] sm:$0xff]  ;;  %v1940_v16 = vld [vmem:[%s4958_s8 + $0x38] sm:$0xff] }
  0x4f   :  { %1261 = vperm.xlu0 %2498, %v1016_v19  }
  0x51   :  { %2352 = vmatmul.msk.f32.gmra.mxu0 %vm60_vm0, %v52_v4  ;;  %2388 = vmatmul.msk.f32.gmra.mxu1 %vm60_vm0, %v498_v18  ;;  %v1939_v4 = vld [vmem:[%s4958_s8 + $0x30] sm:$0xff] }
  0x52   :  { %1453 = vperm.xlu1 %2499, %v1419_v21   ;;  %v1941_v21 = vld [vmem:[%s4958_s8 + $0x40] sm:$0xff] }
  0x53   :  { %1528 = vperm.xlu2 %2500, %v1434_v22  }
  0x54   :  { %2358 = vmatmul.msk.f32.gmra.mxu3 %vm60_vm0, %v58_v30 }
  0x57   :  { %1523 = vperm.xlu0 %2498, %v1433_v25  }
  0x59   :  { %2353 = vmatmul.msk.f32.gmra.mxu0 %vm60_vm0, %v53_v23  ;;  %2389 = vmatmul.msk.f32.gmra.mxu1 %vm60_vm0, %v499_v27  ;;  %v1942_v23 = vld [vmem:[%s4958_s8 + $0x48] sm:$0xff] }
  0x5a   :  { %1518 = vperm.xlu1 %2499, %v1432_v28   ;;  %v1943_v28 = vld [vmem:[%s4958_s8 + $0x50] sm:$0xff] }
  0x5b   :  { %1513 = vperm.xlu2 %2500, %v1431_v29  }
  0x5c   :  { %2359 = vmatmul.msk.f32.gmra.mxu3 %vm60_vm0, %v59_v34 }
  0x5f   :  { %1508 = vperm.xlu0 %2498, %v1430_v31   ;;  %v1944_v31 = vld [vmem:[%s4958_s8 + $0x58] sm:$0xff] }
  0x61   :  { %2390 = vmatmul.msk.f32.gmra.mxu1 %vm60_vm0, %v500_v20 }
  0x62   :  { %1608 = vperm.xlu1 %2499, %v1450_v32  }
  0x63   :  { %1503 = vperm.xlu2 %2500, %v1429_v33  }
  0x67   :  { %1603 = vperm.xlu0 %2498, %v1449_v35   ;;  %v1945_v35 = vld [vmem:[%s4958_s8 + $0x60] sm:$0xff] }
  0x69   :  { %2391 = vmatmul.msk.f32.gmra.mxu1 %vm60_vm0, %v501_v36 }
  0x6a   :  { %1498 = vperm.xlu1 %2499, %v1428_v37  }
  0x6b   :  { %1598 = vperm.xlu2 %2500, %v1448_v39  }
  0x6f   :  { %1493 = vperm.xlu0 %2498, %v1427_v26  }
  0x71   :  { %2392 = vmatmul.msk.f32.gmra.mxu1 %vm60_vm0, %v502_v42 }
  0x72   :  { %1593 = vperm.xlu1 %2499, %v1447_v38   ;;  %v1946_v38 = vld [vmem:[%s4958_s8 + $0x68] sm:$0xff] }
  0x73   :  { %1488 = vperm.xlu2 %2500, %v1426_v43  }
  0x77   :  { %1588 = vperm.xlu0 %2498, %v1446_v44  }
  0x79   :  { %2393 = vmatmul.msk.f32.gmra.mxu1 %vm60_vm0, %v503_v45 }
  0x7a   :  { %1483 = vperm.xlu1 %2499, %v1425_v40  }
  0x7b   :  { %1583 = vperm.xlu2 %2500, %v1445_v48   ;;  %v1947_v48 = vld [vmem:[%s4958_s8 + $0x70] sm:$0xff] }
  0x7f   :  { %1478 = vperm.xlu0 %2498, %v1424_v49  }
  0x81   :  { %2394 = vmatmul.msk.f32.gmra.mxu1 %vm60_vm0, %v504_v50 }
  0x82   :  { %1578 = vperm.xlu1 %2499, %v1444_v51  }
  0x83   :  { %1473 = vperm.xlu2 %2500, %v1423_v53  }
  0x87   :  { %1573 = vperm.xlu0 %2498, %v1443_v52  }
  0x89   :  { %2395 = vmatmul.msk.f32.gmra.mxu1 %vm60_vm0, %v505_v46 }
  0x8a   :  { %1468 = vperm.xlu1 %2499, %v1422_v54  }
  0x8b   :  { %1568 = vperm.xlu2 %2500, %v1442_v55   ;;  %v2175_v55 = vld [vmem:[%s4959_s9] sm:$0xff] }
  0x8e   :  { %v138_v56 = vpop.f32.mrf.mxu0  ;;  %v571_v57 = vpop.f32.mrf.mxu1 }
  0x8f   :  { %1463 = vperm.xlu0 %2498, %v1421_v58   ;;  %v2360_v19 = vmul.f32 -1.442695, %v138_v56  ;;  %v2396_v22 = vmul.f32 -1.442695, %v571_v57 }
  0x91   :  { %2565 = vpow2.f32 %v2360_v19  ;;  %v2179_v19 = vld [vmem:[%s4959_s9 + $0x20] sm:$0xff] }
  0x92   :  { %1563 = vperm.xlu1 %2499, %v1441_v59   ;;  %2567 = vpow2.f32 %v2396_v22 }
  0x93   :  { %1458 = vperm.xlu2 %2500, %v1420_v60  }
  0x96   :  { %v141_v61 = vpop.f32.mrf.mxu0  ;;  %v574_v62 = vpop.f32.mrf.mxu1 }
  0x97   :  { %1558 = vperm.xlu0 %2498, %v1440_v63   ;;  %v2361_v25 = vmul.f32 -1.442695, %v141_v61  ;;  %v2397_v27 = vmul.f32 -1.442695, %v574_v62  ;;  %v2566_v33 = vpop.eup %2565  ;;  %v2176_v62 = vld [vmem:[%s4959_s9 + $0x8] sm:$0xff] }
  0x98   :  { %v2568_v37 = vpop.eup %2567  ;;  %v3538_v26 = vadd.f32 1.0, %v2566_v33  ;;  %v2181_v33 = vld [vmem:[%s4959_s9 + $0x30] sm:$0xff] }
  0x99   :  { %2569 = vpow2.f32 %v2361_v25  ;;  %v3543_v44 = vadd.f32 1.0, %v2568_v37 }
  0x9a   :  { %1553 = vperm.xlu1 %2499, %v1439_v0   ;;  %2571 = vpow2.f32 %v2397_v27  ;;  %5081 = vst [vmem:[#allocation3_spill] sm:$0xff] %v3538_v26  ;;  %v2180_v27 = vld [vmem:[%s4959_s9 + $0x28] sm:$0xff] }
  0x9b   :  { %1548 = vperm.xlu2 %2500, %v1438_v1   ;;  %5082 = vst [vmem:[#allocation4_spill] sm:$0xff] %v3543_v44 }
  0x9e   :  { %v144_v47 = vpop.f32.mrf.mxu0  ;;  %v577_v3 = vpop.f32.mrf.mxu1 }
  0x9f   :  { %1543 = vperm.xlu0 %2498, %v1437_v2   ;;  %v2362_v29 = vmul.f32 -1.442695, %v144_v47  ;;  %v2398_v32 = vmul.f32 -1.442695, %v577_v3  ;;  %v2570_v43 = vpop.eup %2569  ;;  %v2177_v2 = vld [vmem:[%s4959_s9 + $0x10] sm:$0xff] }
  0xa0   :  { %v2572_v45 = vpop.eup %2571  ;;  %v3549_v52 = vadd.f32 1.0, %v2570_v43 }
  0xa1   :  { %2573 = vpow2.f32 %v2362_v29  ;;  %v3552_v54 = vadd.f32 1.0, %v2572_v45  ;;  %v2182_v45 = vld [vmem:[%s4959_s9 + $0x38] sm:$0xff] }
  0xa2   :  { %1538 = vperm.xlu1 %2499, %v1436_v5   ;;  %2575 = vpow2.f32 %v2398_v32  ;;  %5083 = vst [vmem:[#allocation5_spill] sm:$0xff] %v3549_v52 }
  0xa3   :  { %1533 = vperm.xlu2 %2500, %v1435_v6   ;;  %5084 = vst [vmem:[#allocation6_spill] sm:$0xff] %v3552_v54 }
  0xa6   :  { %v147_v7 = vpop.f32.mrf.mxu0  ;;  %v580_v41 = vpop.f32.mrf.mxu1 }
  0xa7   :  { %1951 = vperm.xlu0 %2498, %v1933_v8   ;;  %v2363_v34 = vmul.f32 -1.442695, %v147_v7  ;;  %v2399_v39 = vmul.f32 -1.442695, %v580_v41  ;;  %v2574_v50 = vpop.eup %2573 }
  0xa8   :  { %v2576_v46 = vpop.eup %2575  ;;  %v3559_v57 = vadd.f32 1.0, %v2574_v50 }
  0xa9   :  { %2577 = vpow2.f32 %v2363_v34  ;;  %v3563_v61 = vadd.f32 1.0, %v2576_v46  ;;  %v2183_v46 = vld [vmem:[%s4959_s9 + $0x40] sm:$0xff] }
  0xaa   :  { %1956 = vperm.xlu1 %2499, %v1934_v9   ;;  %2579 = vpow2.f32 %v2399_v39  ;;  %5085 = vst [vmem:[#allocation7_spill] sm:$0xff] %v3559_v57 }
  0xab   :  { %1961 = vperm.xlu2 %2500, %v1935_v10   ;;  %2581 = vrcp.f32 %v3538_v26  ;;  %5086 = vst [vmem:[#allocation8_spill] sm:$0xff] %v3563_v61  ;;  %v2178_v10 = vld [vmem:[%s4959_s9 + $0x18] sm:$0xff] }
  0xae   :  { %v150_v12 = vpop.f32.mrf.mxu0  ;;  %v583_v13 = vpop.f32.mrf.mxu1 }
  0xaf   :  { %1966 = vperm.xlu0 %2498, %v1936_v11   ;;  %v2364_v42 = vmul.f32 -1.442695, %v150_v12  ;;  %v2400_v40 = vmul.f32 -1.442695, %v583_v13  ;;  %v2578_v58 = vpop.eup %2577 }
  0xb0   :  { %v2580_v60 = vpop.eup %2579  ;;  %v3572_v47 = vadd.f32 1.0, %v2578_v58 }
  0xb1   :  { %2583 = vpow2.f32 %v2364_v42  ;;  %v3568_v63 = vpop.eup %2581  ;;  %v3579_v6 = vadd.f32 1.0, %v2580_v60 }
  0xb2   :  { %1971 = vperm.xlu1 %2499, %v1937_v14   ;;  %v3531_v20 = vpop.f32.mrf.mxu3  ;;  %2585 = vrcp.f32 %v3543_v44  ;;  %5087 = vst [vmem:[#allocation9_spill] sm:$0xff] %v3568_v63 }
  0xb3   :  { %1976 = vperm.xlu2 %2500, %v1938_v15   ;;  %2587 = vpow2.f32 %v2400_v40  ;;  %5088 = vst [vmem:[#allocation10_spill] sm:$0xff] %v3572_v47  ;;  %v2370_v8 = vmul.f32 -1.442695, %v3531_v20  ;;  %v16_v15 = vstv %s4960_s10 }
  0xb4   :  { %5090 = vst [vmem:[#allocation12_spill] sm:$0xff] %v3579_v6 }
  0xb5   :  { %17 = vst [vmem:[#allocation2] sm:$0x1] %v16_v15 }
  0xb6   :  { %v3512_v17 = vpop.f32.mrf.mxu1  ;;  %v153_v18 = vpop.f32.mrf.mxu0 }
  0xb7   :  { %1981 = vperm.xlu0 %2498, %v1939_v4   ;;  %v2365_v51 = vmul.f32 -1.442695, %v153_v18  ;;  %v2401_v59 = vmul.f32 -1.442695, %v3512_v17  ;;  %v2584_v1 = vpop.eup %2583 }
  0xb8   :  { %v3577_v5 = vpop.eup %2585  ;;  %v3583_v9 = vadd.f32 1.0, %v2584_v1 }
  0xb9   :  { %2589 = vpow2.f32 %v2365_v51  ;;  %5089 = vst [vmem:[#allocation11_spill] sm:$0xff] %v3577_v5  ;;  %v2588_v7 = vpop.eup %2587  ;;  %v3661_v1 = vmul.f32 %v3577_v5, %v3543_v44 }
  0xba   :  { %1986 = vperm.xlu1 %2499, %v1940_v16   ;;  %v171_v49 = vpop.f32.mrf.mxu3  ;;  %2591 = vrcp.f32 %v3549_v52  ;;  %5091 = vst [vmem:[#allocation13_spill] sm:$0xff] %v3583_v9  ;;  %v3599_v17 = vadd.f32 1.0, %v2588_v7 }
  0xbb   :  { %1991 = vperm.xlu2 %2500, %v1941_v21   ;;  %2593 = vrcp.f32 %v3552_v54  ;;  %v2371_v14 = vmul.f32 -1.442695, %v171_v49  ;;  %5106 = vst [vmem:[#allocation28_spill] sm:$0xff] %v3661_v1 }
  0xbc   :  { %2595 = vrcp.f32 %v3559_v57  ;;  %5094 = vst [vmem:[#allocation16_spill] sm:$0xff] %v3599_v17 }
  0xbd   :  { %2597 = vpow2.f32 %v2401_v59 }
  0xbe   :  { %v3523_v24 = vpop.f32.mrf.mxu1  ;;  %v156_v30 = vpop.f32.mrf.mxu0  ;;  %2599 = vrcp.f32 %v3563_v61 }
  0xbf   :  { %1996 = vperm.xlu0 %2498, %v1942_v23   ;;  %v2366_v0 = vmul.f32 -1.442695, %v156_v30  ;;  %v2590_v41 = vpop.eup %2589  ;;  %v2402_v25 = vmul.f32 -1.442695, %v3523_v24 }
  0xc0   :  { %v3590_v13 = vpop.eup %2591  ;;  %v3603_v16 = vadd.f32 1.0, %v2590_v41 }
  0xc1   :  { %2601 = vpow2.f32 %v2366_v0  ;;  %5092 = vst [vmem:[#allocation14_spill] sm:$0xff] %v3590_v13  ;;  %v3596_v4 = vpop.eup %2593  ;;  %v266_v58 = vmul.f32 %v3590_v13, %v3549_v52 }
  0xc2   :  { %2001 = vperm.xlu1 %2499, %v1943_v28   ;;  %2603 = vrcp.f32 %v3572_v47  ;;  %5093 = vst [vmem:[#allocation15_spill] sm:$0xff] %v3596_v4  ;;  %v3601_v18 = vpop.eup %2595  ;;  %v699_v59 = vmul.f32 %v3596_v4, %v3552_v54  ;;  %v2308_v54 = vld [vmem:[#allocation2] sm:$0x1] }
  0xc3   :  { %2006 = vperm.xlu2 %2500, %v1944_v31   ;;  %2605 = vrcp.f32 %v3579_v6  ;;  %5095 = vst [vmem:[#allocation17_spill] sm:$0xff] %v3601_v18  ;;  %v2598_v21 = vpop.eup %2597 }
  0xc4   :  { %5096 = vst [vmem:[#allocation18_spill] sm:$0xff] %v3603_v16  ;;  %2607 = vpow2.f32 %v2370_v8  ;;  %v3609_v23 = vpop.eup %2599  ;;  %v3619_v20 = vadd.f32 1.0, %v2598_v21  ;;  %v281_v8 = vmul.f32 %v3601_v18, %v3559_v57 }
  0xc5   :  { %2609 = vrcp.f32 %v3583_v9  ;;  %5097 = vst [vmem:[#allocation19_spill] sm:$0xff] %v3609_v23  ;;  %v714_v21 = vmul.f32 %v3609_v23, %v3563_v61 }
  0xc6   :  { %v3536_v36 = vpop.f32.mrf.mxu1  ;;  %v159_v53 = vpop.f32.mrf.mxu0  ;;  %2611 = vpow2.f32 %v2371_v14  ;;  %5099 = vst [vmem:[#allocation21_spill] sm:$0xff] %v3619_v20 }
  0xc7   :  { %2011 = vperm.xlu0 %2498, %v1945_v35   ;;  %v174_v3 = vpop.f32.mrf.mxu3  ;;  %v2367_v22 = vmul.f32 -1.442695, %v159_v53  ;;  %v2602_v29 = vpop.eup %2601  ;;  %2613 = vrcp.f32 %v3599_v17  ;;  %v2403_v24 = vmul.f32 -1.442695, %v3536_v36 }
  0xc8   :  { %v2372_v30 = vmul.f32 -1.442695, %v174_v3  ;;  %v3616_v31 = vpop.eup %2603  ;;  %2615 = vrcp.f32 %v3603_v16  ;;  %v3627_v37 = vadd.f32 1.0, %v2602_v29 }
  0xc9   :  { %5098 = vst [vmem:[#allocation20_spill] sm:$0xff] %v3616_v31  ;;  %v3621_v32 = vpop.eup %2605  ;;  %2617 = vpow2.f32 %v2367_v22 }
  0xca   :  { %2016 = vperm.xlu1 %2499, %v1946_v38   ;;  %5100 = vst [vmem:[#allocation22_spill] sm:$0xff] %v3621_v32  ;;  %v2608_v35 = vpop.eup %2607  ;;  %2619 = vpow2.f32 %v2402_v25 }
  0xcb   :  { %2021 = vperm.xlu2 %2500, %v1947_v48   ;;  %5101 = vst [vmem:[#allocation23_spill] sm:$0xff] %v3627_v37  ;;  %v3629_v39 = vpop.eup %2609  ;;  %2621 = vpow2.f32 %v2372_v30  ;;  %v3640_v48 = vmul.f32 %v3568_v63, %v3538_v26  ;;  %v3643_v50 = vadd.f32 1.0, %v2608_v35 }
  0xcc   :  { %5102 = vst [vmem:[#allocation24_spill] sm:$0xff] %v3629_v39  ;;  %v2612_v43 = vpop.eup %2611  ;;  %2623 = vrcp.f32 %v3619_v20 }
  0xcd   :  { %v3636_v40 = vpop.eup %2613  ;;  %5104 = vst [vmem:[#allocation26_spill] sm:$0xff] %v3640_v48  ;;  %2625 = vpow2.f32 %v2403_v24  ;;  %v3656_v60 = vadd.f32 1.0, %v2612_v43  ;;  %v296_v24 = vmul.f32 %v3616_v31, %v3572_v47  ;;  %v282_v43 = vsub.f32 1.0, %v281_v8 }
  0xce   :  { %v3557_v56 = vpop.f32.mrf.mxu1  ;;  %v162_v11 = vpop.f32.mrf.mxu0  ;;  %5103 = vst [vmem:[#allocation25_spill] sm:$0xff] %v3636_v40  ;;  %2627 = vrcp.f32 %v3627_v37  ;;  %vm405_vm0 = vweird.f32 %v3643_v50 }
  0xcf   :  { %2193 = vperm.xlu0 %2498, %v2175_v55   ;;  %v177_v28 = vpop.f32.mrf.mxu3  ;;  %v2368_v42 = vmul.f32 -1.442695, %v162_v11  ;;  %v2404_v36 = vmul.f32 -1.442695, %v3557_v56  ;;  %v3645_v51 = vpop.eup %2615  ;;  %vm420_vm5 = vweird.f32 %v3656_v60 }
  0xd0   :  { %5105 = vst [vmem:[#allocation27_spill] sm:$0xff] %v3645_v51  ;;  %v2618_v56 = vpop.eup %2617 }
  0xd1   :  { %2629 = vpow2.f32 %v2368_v42  ;;  %v3677_v22 = vadd.f32 1.0, %v2618_v56 }
  0xd2   :  { %2198 = vperm.xlu1 %2499, %v2176_v62   ;;  %v2620_v62 = vpop.eup %2619  ;;  %2631 = vpow2.f32 %v2404_v36 }
  0xd3   :  { %2203 = vperm.xlu2 %2500, %v2177_v2   ;;  %v2373_v2 = vmul.f32 -1.442695, %v177_v28  ;;  %v2622_v7 = vpop.eup %2621  ;;  %2633 = vrcp.f32 %v3643_v50  ;;  %v700_v28 = vsub.f32 1.0, %v699_v59 }
  0xd4   :  { %v3672_v15 = vpop.eup %2623  ;;  %v3688_v35 = vadd.f32 1.0, %v2622_v7  ;;  %v3707_v7 = vadd.f32 1.0, %v2620_v62 }
  0xd5   :  { %5107 = vst [vmem:[#allocation29_spill] sm:$0xff] %v3672_v15  ;;  %v2626_v25 = vpop.eup %2625  ;;  %v3782_v63 = vmul.f32 %v3672_v15, %v3619_v20 }
  0xd6   :  { %v3588_v12 = vpop.f32.mrf.mxu1  ;;  %v165_v38 = vpop.f32.mrf.mxu0  ;;  %5111 = vst [vmem:[#allocation33_spill] sm:$0xff] %v3707_v7  ;;  %v3719_v62 = vadd.f32 1.0, %v2626_v25  ;;  %v3735_v25 = vmul.f32 %v3636_v40, %v3599_v17  ;;  %vm435_vm10 = vweird.f32 %v3688_v35  ;;  %v441_v40 = vand.u32 2147483648, %v3688_v35 }
  0xd7   :  { %2208 = vperm.xlu0 %2498, %v2178_v10   ;;  %v2369_v55 = vmul.f32 -1.442695, %v165_v38  ;;  %v180_v3 = vpop.f32.mrf.mxu3  ;;  %v2184_v10 = vld [vmem:[%s4959_s9 + $0x48] sm:$0xff]  ;;  %v3680_v30 = vpop.eup %2627  ;;  %v729_v38 = vmul.f32 %v3621_v32, %v3579_v6  ;;  %v2405_v56 = vmul.f32 -1.442695, %v3588_v12 }
  0xd8   :  { %v2374_v29 = vmul.f32 -1.442695, %v180_v3  ;;  %5108 = vst [vmem:[#allocation30_spill] sm:$0xff] %v3680_v30  ;;  %v2630_v42 = vpop.eup %2629  ;;  %v3705_v3 = vmul.f32 %v3596_v4, %v700_v28  ;;  %v3717_v28 = vmul.f32 %v3601_v18, %v282_v43 }
  0xd9   :  { %2635 = vpow2.f32 %v2369_v55  ;;  %v715_v55 = vsub.f32 1.0, %v714_v21  ;;  %v730_v49 = vsub.f32 1.0, %v729_v38  ;;  %5113 = vst [vmem:[#allocation35_spill] sm:$0xff] %v3719_v62 }
  0xda   :  { %2213 = vperm.xlu1 %2499, %v2179_v19   ;;  %2637 = vrcp.f32 %v3656_v60  ;;  %5110 = vst [vmem:[#allocation32_spill] sm:$0xff] %v3705_v3 }
  0xdb   :  { %2218 = vperm.xlu2 %2500, %v2180_v27   ;;  %v267_v27 = vsub.f32 1.0, %v266_v58  ;;  %2639 = vpow2.f32 %v2373_v2  ;;  %v2185_v58 = vld [vmem:[%s4959_s9 + $0x50] sm:$0xff]  ;;  %5112 = vst [vmem:[#allocation34_spill] sm:$0xff] %v3717_v28  ;;  %v3729_v19 = vmul.f32 %v3609_v23, %v715_v55  ;;  %v3757_v36 = vmul.f32 %v3621_v32, %v730_v49  ;;  %v2188_v49 = vld [vmem:[%s4959_s9 + $0x68] sm:$0xff] }
  0xdc   :  { %5116 = vst [vmem:[#allocation38_spill] sm:$0xff] %v3735_v25  ;;  %v411_v23 = vand.u32 2147483648, %v3643_v50 }
  0xdd   :  { %v3702_v2 = vmul.f32 %v3590_v13, %v267_v27  ;;  %5115 = vst [vmem:[#allocation37_spill] sm:$0xff] %v3729_v19 }
  0xde   :  { %v601_v34 = vpop.f32.mrf.mxu1  ;;  %5119 = vst [vmem:[#allocation41_spill] sm:$0xff] %v3757_v36 }
  0xdf   :  { %2223 = vperm.xlu0 %2498, %v2181_v33   ;;  %v2406_v11 = vmul.f32 -1.442695, %v601_v34  ;;  %v1948_v34 = vld [vmem:[%s4958_s8 + $0x78] sm:$0xff]  ;;  %5109 = vst [vmem:[#allocation31_spill] sm:$0xff] %v3702_v2 }
  0xe1   :  { %2641 = vpow2.f32 %v2406_v11  ;;  %v3710_v11 = vadd.f32 1.0, %v2630_v42  ;;  %v3726_v42 = vmul.f32 %v3629_v39, %v3583_v9  ;;  %v424_v9 = vand.u32 2147483647, %v3656_v60 }
  0xe2   :  { %2228 = vperm.xlu1 %2499, %v2182_v45   ;;  %v2632_v45 = vpop.eup %2631  ;;  %2643 = vrcp.f32 %v3677_v22 }
  0xe3   :  { %2233 = vperm.xlu2 %2500, %v2183_v46   ;;  %v3699_v59 = vpop.eup %2633  ;;  %2645 = vpow2.f32 %v2374_v29  ;;  %v2186_v29 = vld [vmem:[%s4959_s9 + $0x58] sm:$0xff]  ;;  %5114 = vst [vmem:[#allocation36_spill] sm:$0xff] %v3726_v42  ;;  %v3731_v38 = vadd.f32 1.0, %v2632_v45  ;;  %v3749_v45 = vmul.f32 %v3645_v51, %v3603_v16  ;;  %vm3892_vm13 = vcmp.eq.f32.partialorder %v424_v9, 8.507059e+37 }
  0xe4   :  { %v2636_v8 = vpop.eup %2635  ;;  %2647 = vrcp.f32 %v3688_v35  ;;  %vm406_vm4 = vweird.f32 %v3699_v59 }
  0xe5   :  { %v3713_v21 = vpop.eup %2637  ;;  %2649 = vpow2.f32 %v2405_v56  ;;  %v3740_v53 = vadd.f32 1.0, %v2636_v8  ;;  %5118 = vst [vmem:[#allocation40_spill] sm:$0xff] %v3749_v45  ;;  %v2187_v56 = vld [vmem:[%s4959_s9 + $0x60] sm:$0xff]  ;;  %v183_v8 = vpop.f32.mrf.mxu3  ;;  %vm3850_vm8 = vmor %vm405_vm0, %vm406_vm4 }
  0xe6   :  { %v3670_v14 = vpop.f32.mrf.mxu1  ;;  %2651 = vrcp.f32 %v3707_v7  ;;  %vm421_vm6 = vweird.f32 %v3713_v21 }
  0xe7   :  { %2238 = vperm.xlu0 %2498, %v2184_v10   ;;  %v297_v10 = vsub.f32 1.0, %v296_v24  ;;  %2653 = vrcp.f32 %v3710_v11  ;;  %v2407_v33 = vmul.f32 -1.442695, %v3670_v14  ;;  %v416_v14 = vmul.f32 %v3713_v21, %v3656_v60  ;;  %vm3876_vm12 = vmor %vm420_vm5, %vm421_vm6 }
  0xe8   :  { %2655 = vrcp.f32 %v3719_v62  ;;  %vm390_vm15 = vweird.f32 %v3740_v53 }
  0xe9   :  { %v3745_v55 = vmul.f32 %v3616_v31, %v297_v10  ;;  %v3761_v10 = vmul.f32 %v3680_v30, %v3627_v37  ;;  %2657 = vrcp.f32 %v3731_v38  ;;  %v417_v44 = vsub.f32 1.0, %v416_v14 }
  0xea   :  { %2026 = vperm.xlu1 %2499, %v1948_v34   ;;  %v2640_v34 = vpop.eup %2639  ;;  %2659 = vrcp.f32 %v3740_v53 }
  0xeb   :  { %2243 = vperm.xlu2 %2500, %v2185_v58   ;;  %v2642_v43 = vpop.eup %2641  ;;  %v401_v58 = vmul.f32 %v3699_v59, %v3643_v50  ;;  %5117 = vst [vmem:[#allocation39_spill] sm:$0xff] %v3745_v55  ;;  %v3764_v46 = vadd.f32 1.0, %v2640_v34  ;;  %v2375_v34 = vmul.f32 -1.442695, %v183_v8  ;;  %2661 = vpow2.f32 %v2407_v33  ;;  %v2189_v33 = vld [vmem:[%s4959_s9 + $0x70] sm:$0xff] }
  0xec   :  { %v3742_v0 = vpop.eup %2643  ;;  %v418_v36 = vmul.f32 %v3713_v21, %v417_v44  ;;  %v426_v44 = vand.u32 2147483648, %v3656_v60 }
  0xed   :  { %v2646_v41 = vpop.eup %2645  ;;  %v402_v5 = vsub.f32 1.0, %v401_v58  ;;  %v3791_v58 = vmul.f32 %v3742_v0, %v3677_v22  ;;  %2663 = vrcp.f32 %v3764_v46  ;;  %vm450_vm2 = vweird.f32 %v3764_v46 }
  0xee   :  { %v607_v24 = vpop.f32.mrf.mxu1  ;;  %v3766_v27 = vpop.eup %2647  ;;  %v419_v57 = vadd.f32 %v3713_v21, %v418_v36  ;;  %v454_v47 = vand.u32 2147483647, %v3764_v46 }
  0xef   :  { %2248 = vperm.xlu0 %2498, %v2186_v29   ;;  %v3772_v29 = vadd.f32 1.0, %v2642_v43  ;;  %v2650_v1 = vpop.eup %2649  ;;  %v3784_v43 = vadd.f32 1.0, %v2646_v41  ;;  %v2408_v12 = vmul.f32 -1.442695, %v607_v24  ;;  %v2190_v24 = vld [vmem:[%s4959_s9 + $0x78] sm:$0xff]  ;;  %vm436_vm11 = vweird.f32 %v3766_v27 }
  0xf0   :  { %v3786_v48 = vpop.eup %2651  ;;  %v3804_v61 = vadd.f32 1.0, %v2650_v1  ;;  %v409_v1 = vand.u32 2147483647, %v3643_v50  ;;  %vm3904_vm14 = vmor %vm435_vm10, %vm436_vm11  ;;  %v423_v9 = vsel %vm3876_vm12, %v3713_v21, %v419_v57  ;;  %v396_v57 = vand.u32 2147483648, %v3740_v53 }
  0xf1   :  { %5120 = vst [vmem:[#allocation42_spill] sm:$0xff] %v3786_v48  ;;  %v3799_v8 = vpop.eup %2653  ;;  %2665 = vrcp.f32 %v3772_v29  ;;  %v3812_v26 = vmul.f32 %v3786_v48, %v3707_v7  ;;  %vm838_vm0 = vweird.f32 %v3772_v29  ;;  %vm455_vm12 = vcmp.eq.f32.partialorder %v454_v47, 8.507059e+37 }
  0xf2   :  { %2253 = vperm.xlu1 %2499, %v2187_v56   ;;  %v431_v56 = vmul.f32 %v3766_v27, %v3688_v35  ;;  %v3802_v2 = vpop.eup %2655  ;;  %2667 = vpow2.f32 %v2375_v34  ;;  %v3824_v14 = vmul.f32 %v3799_v8, %v3710_v11  ;;  %vm3854_vm9 = vcmp.eq.f32.partialorder %v409_v1, 8.507059e+37 }
  0xf3   :  { %2258 = vperm.xlu2 %2500, %v2188_v49   ;;  %v403_v49 = vmul.f32 %v3699_v59, %v402_v5  ;;  %v3808_v19 = vpop.eup %2657  ;;  %2669 = vrcp.f32 %v3784_v43  ;;  %v3964_v25 = vor.u32 1.1754944e-38, %v396_v57 }
  0xf4   :  { %v3820_v5 = vpop.eup %2659  ;;  %v432_v34 = vsub.f32 1.0, %v431_v56  ;;  %v3837_v55 = vmul.f32 %v3808_v19, %v3731_v38  ;;  %v412_v56 = vor.u32 1.1754944e-38, %v411_v23 }
  0xf5   :  { %vm391_vm1 = vweird.f32 %v3820_v5 }
  0xf6   :  { %v610_v41 = vpop.f32.mrf.mxu1  ;;  %v433_v17 = vmul.f32 %v3766_v27, %v432_v34  ;;  %v386_v34 = vmul.f32 %v3820_v5, %v3740_v53  ;;  %vm3999_vm10 = vmor %vm390_vm15, %vm391_vm1 }
  0xf7   :  { %v2409_v3 = vmul.f32 -1.442695, %v610_v41  ;;  %2263 = vperm.xlu0 %2498, %v2189_v33   ;;  %v2662_v41 = vpop.eup %2661  ;;  %v3830_v33 = vmul.f32 %v3802_v2, %v3719_v62 }
  0xf8   :  { %v3833_v4 = vpop.eup %2663  ;;  %v3859_v13 = vadd.f32 1.0, %v2662_v41  ;;  %v434_v60 = vadd.f32 %v3766_v27, %v433_v17 }
  0xf9   :  { %2671 = vpow2.f32 %v2409_v3  ;;  %v404_v3 = vadd.f32 %v3699_v59, %v403_v49  ;;  %v3841_v28 = vpop.eup %2665  ;;  %v446_v18 = vmul.f32 %v3833_v4, %v3764_v46  ;;  %v427_v49 = vor.u32 1.1754944e-38, %v426_v44 }
  0xfa   :  { %2673 = vpow2.f32 %v2408_v12  ;;  %2268 = vperm.xlu1 %2499, %v2190_v24   ;;  %v2668_v23 = vpop.eup %2667  ;;  %vm451_vm3 = vweird.f32 %v3833_v4  ;;  %vm839_vm5 = vweird.f32 %v3841_v28  ;;  %vm853_vm15 = vweird.f32 %v3859_v13 }
  0xfb   :  { %2675 = vrcp.f32 %v3804_v61  ;;  %2311 = vperm.xlu2 %2500, %v2308_v54   ;;  %v3863_v50 = vpop.eup %2669  ;;  %v3885_v41 = vadd.f32 1.0, %v2668_v23  ;;  %v3933_v24 = vsel %vm3892_vm13, %v427_v49, %v423_v9  ;;  %v844_v54 = vand.u32 2147483648, %v3772_v29  ;;  %vm3959_vm4 = vmor %vm450_vm2, %vm451_vm3 }
  0xfc   :  { %v461_v23 = vmul.f32 %v3863_v50, %v3784_v43  ;;  %v456_v49 = vand.u32 2147483648, %v3764_v46  ;;  %vm4024_vm13 = vmor %vm838_vm0, %vm839_vm5 }
  0xfd   :  { %vm480_vm2 = vweird.f32 %v3885_v41 }
  0xfe   :  { %v613_v52 = vpop.f32.mrf.mxu1  ;;  %v462_v44 = vsub.f32 1.0, %v461_v23  ;;  %v457_v46 = vor.u32 1.1754944e-38, %v456_v49  ;;  %v469_v49 = vand.u32 2147483647, %v3784_v43 }
  0xff   :  { %v2410_v1 = vmul.f32 -1.442695, %v613_v52  ;;  %v2672_v20 = vpop.eup %2671  ;;  %v408_v52 = vsel %vm3850_vm8, %v3699_v59, %v404_v3  ;;  %v834_v59 = vmul.f32 %v3841_v28, %v3772_v29  ;;  %v447_v3 = vsub.f32 1.0, %v446_v18 }
 0x100   :  { %v2674_v36 = vpop.eup %2673  ;;  %v3898_v12 = vadd.f32 1.0, %v2672_v20  ;;  %v439_v18 = vand.u32 2147483647, %v3688_v35  ;;  %v3918_v20 = vsel %vm3854_vm9, %v412_v56, %v408_v52  ;;  %v438_v35 = vsel %vm3904_vm14, %v3766_v27, %v434_v60 }
 0x101   :  { %2677 = vpow2.f32 %v2410_v1  ;;  %v3887_v6 = vpop.eup %2675  ;;  %v3911_v17 = vadd.f32 1.0, %v2674_v36  ;;  %v387_v1 = vsub.f32 1.0, %v386_v34  ;;  %v442_v56 = vor.u32 1.1754944e-38, %v441_v40 }
 0x102   :  { %2679 = vrcp.f32 %v3859_v13  ;;  %v3922_v39 = vmul.f32 %v3887_v6, %v3804_v61  ;;  %v835_v36 = vsub.f32 1.0, %v834_v59  ;;  %v448_v42 = vmul.f32 %v3833_v4, %v447_v3 }
 0x103   :  { %2681 = vrcp.f32 %v3885_v41  ;;  %vm440_vm7 = vcmp.eq.f32.partialorder %v439_v18, 8.507059e+37  ;;  %v842_v40 = vand.u32 2147483647, %v3772_v29  ;;  %v463_v18 = vmul.f32 %v3863_v50, %v462_v44 }
 0x104   :  { %2683 = vrcp.f32 %v3898_v12  ;;  %v449_v3 = vadd.f32 %v3833_v4, %v448_v42  ;;  %v3955_v9 = vsel %vm440_vm7, %v442_v56, %v438_v35  ;;  %v836_v23 = vmul.f32 %v3841_v28, %v835_v36 }
 0x105   :  { %2685 = vrcp.f32 %v3911_v17  ;;  %v859_v35 = vand.u32 2147483648, %v3859_v13  ;;  %vm3972_vm6 = vcmp.eq.f32.partialorder %v842_v40, 8.507059e+37  ;;  %vm465_vm8 = vweird.f32 %v3784_v43 }
 0x106   :  { %v616_v21 = vpop.f32.mrf.mxu1  ;;  %vm466_vm9 = vweird.f32 %v3863_v50  ;;  %v471_v44 = vand.u32 2147483648, %v3784_v43  ;;  %v453_v40 = vsel %vm3959_vm4, %v3833_v4, %v449_v3  ;;  %v837_v42 = vadd.f32 %v3841_v28, %v836_v23 }
 0x107   :  { %v2678_v52 = vpop.eup %2677  ;;  %v2411_v34 = vmul.f32 -1.442695, %v616_v21  ;;  %v464_v45 = vadd.f32 %v3863_v50, %v463_v18  ;;  %vm4007_vm11 = vmor %vm465_vm8, %vm466_vm9  ;;  %v4011_v23 = vor.u32 1.1754944e-38, %v859_v35  ;;  %v874_v7 = vand.u32 2147483648, %v3911_v17 }
 0x108   :  { %v3938_v32 = vpop.eup %2679  ;;  %v3941_v27 = vadd.f32 1.0, %v2678_v52  ;;  %v845_v52 = vor.u32 1.1754944e-38, %v844_v54  ;;  %v472_v35 = vor.u32 1.1754944e-38, %v471_v44  ;;  %vm470_vm14 = vcmp.eq.f32.partialorder %v469_v49, 8.507059e+37 }
 0x109   :  { %2687 = vpow2.f32 %v2411_v34  ;;  %v3950_v60 = vpop.eup %2681  ;;  %v849_v59 = vmul.f32 %v3938_v32, %v3859_v13  ;;  %v388_v34 = vmul.f32 %v3820_v5, %v387_v1  ;;  %v468_v48 = vsel %vm4007_vm11, %v3863_v50, %v464_v45 }
 0x10a   :  { %2689 = vrcp.f32 %v3941_v27  ;;  %v3966_v31 = vpop.eup %2683  ;;  %v476_v1 = vmul.f32 %v3950_v60, %v3885_v41  ;;  %v4035_v62 = vsel %vm455_vm12, %v457_v46, %v453_v40  ;;  %v872_v30 = vand.u32 2147483647, %v3911_v17 }
 0x10b   :  { %v3976_v36 = vpop.eup %2685  ;;  %v850_v54 = vsub.f32 1.0, %v849_v59  ;;  %v879_v15 = vmul.f32 %v3966_v31, %v3898_v12  ;;  %v4014_v18 = vadd.f32 %v3820_v5, %v388_v34  ;;  %vm854_vm1 = vweird.f32 %v3938_v32 }
 0x10c   :  { %v864_v21 = vmul.f32 %v3976_v36, %v3911_v17  ;;  %v4046_v45 = vor.u32 1.1754944e-38, %v874_v7  ;;  %v4052_v46 = vsel %vm470_vm14, %v472_v35, %v468_v48  ;;  %vm869_vm7 = vweird.f32 %v3976_v36 }
 0x10d   :  { %v851_v34 = vmul.f32 %v3938_v32, %v850_v54  ;;  %v880_v37 = vsub.f32 1.0, %v879_v15  ;;  %v5141_v44 = vsub.f32 1.0, %v3922_v39  ;;  %vm481_vm3 = vweird.f32 %v3950_v60 }
 0x10e   :  { %v486_v7 = vand.u32 2147483648, %v3885_v41  ;;  %vm883_vm5 = vweird.f32 %v3898_v12  ;;  %v904_v3 = vand.u32 2147483648, %v3941_v27  ;;  %vm898_vm8 = vweird.f32 %v3941_v27 }
 0x10f   :  { %v2688_v57 = vpop.eup %2687  ;;  %v4056_v54 = vadd.f32 %v3938_v32, %v851_v34  ;;  %v821_v40 = vmul.f32 %v3887_v6, %v5141_v44  ;;  %v902_v43 = vand.u32 2147483647, %v3941_v27  ;;  %v5144_v35 = vand.u32 2147483647, %v3859_v13 }
 0x110   :  { %v3987_v16 = vpop.eup %2689  ;;  %v3991_v51 = vadd.f32 1.0, %v2688_v57  ;;  %v477_v57 = vsub.f32 1.0, %v476_v1  ;;  %v841_v1 = vsel %vm4024_vm13, %v3841_v28, %v837_v42  ;;  %v865_v28 = vsub.f32 1.0, %v864_v21 }
 0x111   :  { %v894_v4 = vmul.f32 %v3987_v16, %v3941_v27  ;;  %v4050_v50 = vsel %vm3972_vm6, %v845_v52, %v841_v1  ;;  %v881_v52 = vmul.f32 %v3966_v31, %v880_v37  ;;  %vm899_vm4 = vweird.f32 %v3987_v16  ;;  %vm4074_vm6 = vmor %vm480_vm2, %vm481_vm3 }
 0x112   :  { %2691 = vrcp.f32 %v3991_v51  ;;  %v478_v42 = vmul.f32 %v3950_v60, %v477_v57  ;;  %v866_v21 = vmul.f32 %v3976_v36, %v865_v28  ;;  %vm4083_vm9 = vcmp.eq.f32.partialorder %v5144_v35, 8.507059e+37  ;;  %vm4090_vm11 = vmor %vm898_vm8, %vm899_vm4 }
 0x113   :  { %v895_v47 = vsub.f32 1.0, %v894_v4  ;;  %v484_v4 = vand.u32 2147483647, %v3885_v41  ;;  %v1337_v41 = vpop.permute.xlu0 %1336  ;;  %v487_v1 = vor.u32 1.1754944e-38, %v486_v7  ;;  %v882_v27 = vadd.f32 %v3966_v31, %v881_v52  ;;  %vm4119_vm8 = vmor %vm853_vm15, %vm854_vm1 }
 0x114   :  { %v479_v39 = vadd.f32 %v3950_v60, %v478_v42  ;;  %vm884_vm12 = vweird.f32 %v3966_v31  ;;  %vm4096_vm13 = vcmp.eq.f32.partialorder %v872_v30, 8.507059e+37  ;;  %v917_v7 = vand.u32 2147483647, %v3991_v51 }
 0x115   :  { %v896_v29 = vmul.f32 %v3987_v16, %v895_v47  ;;  %v889_v47 = vand.u32 2147483648, %v3898_v12  ;;  %v5151_v35 = vand.u32 2147483647, %v3740_v53  ;;  %vm485_vm4 = vcmp.eq.f32.partialorder %v484_v4, 8.507059e+37 }
 0x116   :  { %v483_v30 = vsel %vm4074_vm6, %v3950_v60, %v479_v39  ;;  %v905_v15 = vor.u32 1.1754944e-38, %v904_v3  ;;  %vm903_vm14 = vcmp.eq.f32.partialorder %v902_v43, 8.507059e+37  ;;  %vm4128_vm6 = vmor %vm883_vm5, %vm884_vm12  ;;  %v4137_v3 = vpop.permute.xlu2 %1316  ;;  %vm918_vm15 = vcmp.eq.f32.partialorder %v917_v7, 8.507059e+37 }
 0x117   :  { %v897_v56 = vadd.f32 %v3987_v16, %v896_v29  ;;  %v919_v29 = vand.u32 2147483648, %v3991_v51  ;;  %vm4107_vm3 = vcmp.eq.f32.partialorder %v5151_v35, 8.507059e+37  ;;  %v890_v4 = vor.u32 1.1754944e-38, %v889_v47 }
 0x118   :  { %v2692_v49 = vpop.eup %2691  ;;  %v886_v43 = vsel %vm4128_vm6, %v3966_v31, %v882_v27  ;;  %vm5158_vm1 = vweird.f32 %v3911_v17  ;;  %v829_v17 = vand.u32 2147483648, %v3804_v61  ;;  %v827_v28 = vand.u32 2147483647, %v3804_v61 }
 0x119   :  { %v909_v48 = vmul.f32 %v2692_v49, %v3991_v51  ;;  %vm914_vm2 = vweird.f32 %v2692_v49  ;;  %v920_v13 = vor.u32 1.1754944e-38, %v919_v29  ;;  %vm4146_vm5 = vmor %vm5158_vm1, %vm869_vm7  ;;  %vm5161_vm7 = vweird.f32 %v3804_v61 }
 0x11a   :  { %v5164_v7 = vsub.f32 1.0, %v3824_v14  ;;  %v5165_v34 = vsub.f32 1.0, %v3837_v55  ;;  %v830_v42 = vor.u32 1.1754944e-38, %v829_v17  ;;  %v1369_v55 = vld [vmem:[%s4961_s2 + $0x70] sm:$0xff]  ;;  %v379_v35 = vand.u32 2147483647, %v3710_v11 }
 0x11b   :  { %v910_v57 = vsub.f32 1.0, %v909_v48  ;;  %v901_v48 = vsel %vm4090_vm11, %v3987_v16, %v897_v56  ;;  %vm913_vm11 = vweird.f32 %v3991_v51  ;;  %v887_v56 = vand.u32 2147483647, %v3898_v12 }
 0x11c   :  { %vm915_vm0 = vmor %vm913_vm11, %vm914_vm2  ;;  %v906_v39 = vsel %vm903_vm14, %v905_v15, %v901_v48  ;;  %v856_v51 = vsel %vm4119_vm8, %v3938_v32, %v4056_v54  ;;  %v822_v54 = vadd.f32 %v3887_v6, %v821_v40  ;;  %v1253_v40 = vsub.f32 %v3918_v20, %v4050_v50  ;;  %v1332_v50 = vpop.permute.xlu0 %1331 }
 0x11d   :  { %v911_v44 = vmul.f32 %v2692_v49, %v910_v57  ;;  %v867_v57 = vadd.f32 %v3976_v36, %v866_v21  ;;  %v488_v21 = vsel %vm485_vm4, %v487_v1, %v483_v30  ;;  %v1257_v31 = vsub.f32 %v4052_v46, %v906_v39  ;;  %v1370_v1 = vld [vmem:[%s4961_s2 + $0x78] sm:$0xff] }
 0x11e   :  { %vm888_vm12 = vcmp.eq.f32.partialorder %v887_v56, 8.507059e+37  ;;  %v806_v20 = vmul.f32 %v3808_v19, %v5165_v34  ;;  %vm376_vm2 = vweird.f32 %v3799_v8  ;;  %v5166_v48 = vsel %vm3999_vm10, %v3820_v5, %v4014_v18 }
 0x11f   :  { %v912_v53 = vadd.f32 %v2692_v49, %v911_v44  ;;  %v871_v32 = vsel %vm4146_vm5, %v3976_v36, %v867_v57  ;;  %v891_v29 = vsel %vm888_vm12, %v890_v4, %v886_v43  ;;  %v861_v36 = vsel %vm4083_vm9, %v4011_v23, %v856_v51 }
 0x120   :  { %v876_v46 = vsel %vm4096_vm13, %v4046_v45, %v871_v32  ;;  %v373_v23 = vmul.f32 %v3799_v8, %v5164_v7  ;;  %vm1611_vm9 = vcmask 261120   ;;  %vm375_vm13 = vweird.f32 %v3710_v11 }
 0x121   :  { %v916_v37 = vsel %vm915_vm0, %v2692_v49, %v912_v53  ;;  %vm824_vm0 = vweird.f32 %v3887_v6  ;;  %v1327_v49 = vpop.permute.xlu1 %1326  ;;  %v1256_v14 = vsub.f32 %v4035_v62, %v891_v29  ;;  %vm828_vm4 = vcmp.eq.f32.partialorder %v827_v28, 8.507059e+37  ;;  %v1312_v53 = vpop.permute.xlu2 %1311 }
 0x122   :  { %v921_v15 = vsel %vm918_vm15, %v920_v13, %v916_v37  ;;  %vm4171_vm14 = vmor %vm5161_vm7, %vm824_vm0  ;;  %v381_v30 = vand.u32 2147483648, %v3710_v11  ;;  %v374_v57 = vadd.f32 %v3799_v8, %v373_v23  ;;  %v807_v59 = vadd.f32 %v3808_v19, %v806_v20  ;;  %v5177_v23 = vld [vmem:[#allocation30_spill] sm:$0xff] }
 0x123   :  { %v1258_v47 = vsub.f32 %v488_v21, %v921_v15  ;;  %v826_v45 = vsel %vm4171_vm14, %v3887_v6, %v822_v54  ;;  %v398_v6 = vsel %vm4107_vm3, %v3964_v25, %v5166_v48  ;;  %vm809_vm10 = vweird.f32 %v3808_v19  ;;  %vm4212_vm3 = vmor %vm375_vm13, %vm376_vm2  ;;  %v5195_v21 = vld [vmem:[#allocation10_spill] sm:$0xff] }
 0x124   :  { %v831_v62 = vsel %vm828_vm4, %v830_v42, %v826_v45  ;;  %v790_v5 = vsub.f32 1.0, %v3830_v33  ;;  %v1255_v25 = vsub.f32 %v3955_v9, %v876_v46  ;;  %v1254_v18 = vsub.f32 %v3933_v24, %v861_v36  ;;  %v1368_v24 = vld [vmem:[%s4961_s2 + $0x68] sm:$0xff] }
 0x125   :  { %v1354_v27 = vmul.f32 %v1337_v41, %v1258_v47  ;;  %v1353_v41 = vmul.f32 %v1332_v50, %v1257_v31  ;;  %v814_v16 = vand.u32 2147483648, %v3731_v38  ;;  %v1352_v56 = vmul.f32 %v1327_v49, %v1256_v14  ;;  %v5178_v45 = vld [vmem:[#allocation35_spill] sm:$0xff] }
 0x126   :  { %vm808_vm8 = vweird.f32 %v3731_v38  ;;  %v812_v33 = vand.u32 2147483647, %v3731_v38  ;;  %v775_v9 = vsub.f32 1.0, %v3812_v26  ;;  %v1349_v11 = vmul.f32 %v1312_v53, %v1253_v40  ;;  %v1365_v26 = vld [vmem:[%s4961_s2 + $0x50] sm:$0xff]  ;;  %v5180_v42 = vld [vmem:[#allocation23_spill] sm:$0xff] }
 0x127   :  { %v1386_v61 = vmul.f32 %v1370_v1, %v1354_v27  ;;  %v1385_v60 = vmul.f32 %v1369_v55, %v1353_v41  ;;  %v1252_v13 = vsub.f32 %v398_v6, %v831_v62  ;;  %v382_v39 = vor.u32 1.1754944e-38, %v381_v30  ;;  %vm4225_vm11 = vmor %vm808_vm8, %vm809_vm10  ;;  %v1364_v27 = vld [vmem:[%s4961_s2 + $0x48] sm:$0xff] }
 0x128   :  { %v378_v38 = vsel %vm4212_vm3, %v3799_v8, %v374_v57  ;;  %vm4237_vm6 = vcmp.eq.f32.partialorder %v379_v35, 8.507059e+37  ;;  %v811_v37 = vsel %vm4225_vm11, %v3808_v19, %v807_v59  ;;  %v5173_v43 = vsub.f32 1.0, %v3791_v58  ;;  %v1366_v8 = vld [vmem:[%s4961_s2 + $0x58] sm:$0xff]  ;;  %v1307_v19 = vpop.permute.xlu0 %1306 }
 0x129   :  { %2428 = vmatpush.xpose.msk.msrb.mxu1 %vm1611_vm9, %v1386_v61  ;;  %2481 = vmatpush.xpose.msk.msra.mxu2 %vm1611_vm9, %v1386_v61  ;;  %v1322_v51 = vpop.permute.xlu1 %1321  ;;  %v1350_v32 = vmul.f32 %v4137_v3, %v1254_v18  ;;  %v815_v54 = vor.u32 1.1754944e-38, %v814_v16  ;;  %v791_v49 = vmul.f32 %v3802_v2, %v790_v5  ;;  %v1384_v47 = vmul.f32 %v1368_v24, %v1352_v56  ;;  %v1367_v3 = vld [vmem:[%s4961_s2 + $0x60] sm:$0xff]  ;;  %v5187_v18 = vld [vmem:[#allocation33_spill] sm:$0xff]  ;;  %v5188_v16 = vld [vmem:[#allocation40_spill] sm:$0xff]  ;;  %v1297_v48 = vpop.permute.xlu2 %1296 }
 0x12a   :  { %v358_v12 = vmul.f32 %v3742_v0, %v5173_v43  ;;  %v1351_v15 = vmul.f32 %v1322_v51, %v1255_v25  ;;  %vm813_vm15 = vcmp.eq.f32.partialorder %v812_v33, 8.507059e+37  ;;  %vm360_vm1 = vweird.f32 %v3677_v22  ;;  %v5179_v61 = vld [vmem:[#allocation42_spill] sm:$0xff] }
 0x12b   :  { %vm361_vm5 = vweird.f32 %v3742_v0  ;;  %v760_v58 = vsub.f32 1.0, %v3782_v63  ;;  %v4258_v31 = vmul.f32 %v1365_v26, %v1349_v11  ;;  %v383_v17 = vsel %vm4237_vm6, %v382_v39, %v378_v38 }
 0x12c   :  { %v816_v1 = vsel %vm813_vm15, %v815_v54, %v811_v37  ;;  %v1348_v29 = vmul.f32 %v1307_v19, %v1252_v13  ;;  %v359_v36 = vadd.f32 %v3742_v0, %v358_v12  ;;  %v364_v40 = vand.u32 2147483647, %v3677_v22  ;;  %vm4274_vm0 = vmor %vm360_vm1, %vm361_vm5  ;;  %v5192_v13 = vld [vmem:[#allocation18_spill] sm:$0xff]  ;;  %v5196_v37 = vld [vmem:[#allocation20_spill] sm:$0xff] }
 0x12d   :  { %2429 = vmatpush.xpose.msk.msrb.mxu1 %vm1611_vm9, %v1385_v60  ;;  %2482 = vmatpush.xpose.msk.msra.mxu2 %vm1611_vm9, %v1385_v60  ;;  %v366_v63 = vand.u32 2147483648, %v3677_v22  ;;  %v1382_v28 = vmul.f32 %v1366_v8, %v1350_v32  ;;  %v792_v44 = vadd.f32 %v3802_v2, %v791_v49  ;;  %vm794_vm12 = vweird.f32 %v3802_v2  ;;  %v5201_v19 = vld [vmem:[#allocation22_spill] sm:$0xff] }
 0x12e   :  { %v5176_v7 = vsub.f32 1.0, %v3761_v10  ;;  %v1383_v20 = vmul.f32 %v1367_v3, %v1351_v15  ;;  %v1251_v50 = vsub.f32 %v383_v17, %v816_v1  ;;  %vm793_vm7 = vweird.f32 %v5178_v45  ;;  %v5202_v3 = vld [vmem:[#allocation36_spill] sm:$0xff] }
 0x12f   :  { %v776_v41 = vmul.f32 %v5179_v61, %v775_v9  ;;  %v797_v22 = vand.u32 2147483647, %v5178_v45  ;;  %v799_v14 = vand.u32 2147483648, %v5178_v45  ;;  %vm345_vm14 = vweird.f32 %v5180_v42  ;;  %vm4302_vm4 = vmor %vm793_vm7, %vm794_vm12  ;;  %v5191_v9 = vld [vmem:[#allocation29_spill] sm:$0xff]  ;;  %v5204_v1 = vld [vmem:[#allocation24_spill] sm:$0xff] }
 0x130   :  { %v343_v34 = vmul.f32 %v5177_v23, %v5176_v7  ;;  %vm346_vm13 = vweird.f32 %v5177_v23  ;;  %v4291_v10 = vmul.f32 %v1364_v27, %v1348_v29  ;;  %v363_v55 = vsel %vm4274_vm0, %v3742_v0, %v359_v36  ;;  %v5205_v36 = vld [vmem:[#allocation38_spill] sm:$0xff]  ;;  %v1292_v38 = vpop.permute.xlu0 %1291 }
 0x131   :  { %2430 = vmatpush.xpose.msk.msrb.mxu1 %vm1611_vm9, %v1384_v47  ;;  %2483 = vmatpush.xpose.msk.msra.mxu2 %vm1611_vm9, %v1384_v47  ;;  %vm4296_vm2 = vcmp.eq.f32.partialorder %v364_v40, 8.507059e+37  ;;  %v367_v6 = vor.u32 1.1754944e-38, %v366_v63  ;;  %v796_v30 = vsel %vm4302_vm4, %v3802_v2, %v792_v44  ;;  %v349_v57 = vand.u32 2147483647, %v5180_v42  ;;  %v1302_v59 = vpop.permute.xlu1 %1301  ;;  %vm4312_vm10 = vmor %vm345_vm14, %vm346_vm13  ;;  %v5190_v2 = vld [vmem:[#allocation27_spill] sm:$0xff]  ;;  %v5207_v63 = vld [vmem:[#allocation25_spill] sm:$0xff] }
 0x132   :  { %v344_v62 = vadd.f32 %v5177_v23, %v343_v34  ;;  %v351_v0 = vand.u32 2147483648, %v5180_v42  ;;  %v777_v25 = vadd.f32 %v5179_v61, %v776_v41  ;;  %vm779_vm3 = vweird.f32 %v5179_v61  ;;  %v5208_v44 = vld [vmem:[#allocation21_spill] sm:$0xff] }
 0x133   :  { %v784_v52 = vand.u32 2147483648, %v5187_v18  ;;  %v5189_v53 = vsub.f32 1.0, %v5188_v16  ;;  %v1347_v56 = vmul.f32 %v1302_v59, %v1251_v50  ;;  %vm798_vm8 = vcmp.eq.f32.partialorder %v797_v22, 8.507059e+37  ;;  %v5211_v34 = vld [vmem:[#allocation17_spill] sm:$0xff]  ;;  %v5249_v59 = vld [vmem:[#allocation32_spill] sm:$0xff] }
 0x134   :  { %v800_v33 = vor.u32 1.1754944e-38, %v799_v14  ;;  %v761_v24 = vmul.f32 %v5191_v9, %v760_v58  ;;  %vm778_vm11 = vweird.f32 %v5187_v18  ;;  %v782_v11 = vand.u32 2147483647, %v5187_v18  ;;  %v5214_v41 = vld [vmem:[#allocation13_spill] sm:$0xff]  ;;  %v5221_v18 = vld [vmem:[#allocation14_spill] sm:$0xff] }
 0x135   :  { %2431 = vmatpush.xpose.msk.msrb.mxu1 %vm1611_vm9, %v1383_v20  ;;  %2484 = vmatpush.xpose.msk.msra.mxu2 %vm1611_vm9, %v1383_v20  ;;  %v328_v60 = vmul.f32 %v5190_v2, %v5189_v53  ;;  %vm330_vm6 = vweird.f32 %v5192_v13  ;;  %vm331_vm15 = vweird.f32 %v5190_v2  ;;  %v368_v39 = vsel %vm4296_vm2, %v367_v6, %v363_v55  ;;  %vm4336_vm1 = vmor %vm778_vm11, %vm779_vm3  ;;  %v1363_v20 = vld [vmem:[%s4961_s2 + $0x40] sm:$0xff] }
 0x136   :  { %v801_v4 = vsel %vm798_vm8, %v800_v33, %v796_v30  ;;  %v348_v51 = vsel %vm4312_vm10, %v5177_v23, %v344_v62  ;;  %v352_v26 = vor.u32 1.1754944e-38, %v351_v0  ;;  %vm300_vm5 = vweird.f32 %v5195_v21  ;;  %vm4350_vm7 = vmor %vm330_vm6, %vm331_vm15  ;;  %v5209_v23 = vld [vmem:[#allocation12_spill] sm:$0xff]  ;;  %v5222_v53 = vld [vmem:[#allocation39_spill] sm:$0xff] }
 0x137   :  { %vm301_vm0 = vweird.f32 %v5196_v37  ;;  %vm4342_vm12 = vcmp.eq.f32.partialorder %v349_v57, 8.507059e+37  ;;  %v781_v12 = vsel %vm4336_vm1, %v5179_v61, %v777_v25  ;;  %v785_v15 = vor.u32 1.1754944e-38, %v784_v52  ;;  %v5220_v25 = vld [vmem:[#allocation5_spill] sm:$0xff] }
 0x138   :  { %v329_v32 = vadd.f32 %v5190_v2, %v328_v60  ;;  %v334_v49 = vand.u32 2147483647, %v5192_v13  ;;  %v336_v47 = vand.u32 2147483648, %v5192_v13  ;;  %v762_v8 = vadd.f32 %v5191_v9, %v761_v24  ;;  %v1362_v60 = vld [vmem:[%s4961_s2 + $0x38] sm:$0xff] }
 0x139   :  { %2432 = vmatpush.xpose.msk.msrb.mxu1 %vm1611_vm9, %v1382_v28  ;;  %2485 = vmatpush.xpose.msk.msra.mxu2 %vm1611_vm9, %v1382_v28  ;;  %vm764_vm14 = vweird.f32 %v5191_v9  ;;  %vm734_vm13 = vweird.f32 %v5201_v19  ;;  %v1250_v58 = vsub.f32 %v368_v39, %v801_v4  ;;  %vm783_vm2 = vcmp.eq.f32.partialorder %v782_v11, 8.507059e+37  ;;  %v5225_v11 = vld [vmem:[#allocation15_spill] sm:$0xff]  ;;  %v5226_v13 = vld [vmem:[#allocation41_spill] sm:$0xff] }
 0x13a   :  { %v5203_v17 = vsub.f32 1.0, %v5202_v3  ;;  %v5206_v40 = vsub.f32 1.0, %v5205_v36  ;;  %v353_v27 = vsel %vm4342_vm12, %v352_v26, %v348_v51  ;;  %v786_v46 = vsel %vm783_vm2, %v785_v15, %v781_v12  ;;  %v5238_v36 = vld [vmem:[#allocation34_spill] sm:$0xff] }
 0x13b   :  { %vm763_vm4 = vweird.f32 %v5208_v44  ;;  %v769_v7 = vand.u32 2147483648, %v5208_v44  ;;  %vm733_vm10 = vweird.f32 %v5209_v23  ;;  %vm286_vm8 = vweird.f32 %v5211_v34 }
 0x13c   :  { %v313_v29 = vmul.f32 %v5204_v1, %v5203_v17  ;;  %v746_v28 = vmul.f32 %v5207_v63, %v5206_v40  ;;  %v333_v50 = vsel %vm4350_vm7, %v5190_v2, %v329_v32  ;;  %vm4384_vm11 = vmor %vm763_vm4, %vm764_vm14  ;;  %v767_v61 = vand.u32 2147483647, %v5208_v44 }
 0x13d   :  { %2433 = vmatpush.xpose.msk.msrb.mxu1 %vm1611_vm9, %v4258_v31  ;;  %2486 = vmatpush.xpose.msk.msra.mxu2 %vm1611_vm9, %v4258_v31  ;;  %v5210_v31 = vld [vmem:[#allocation7_spill] sm:$0xff]  ;;  %vm315_vm6 = vweird.f32 %v5214_v41  ;;  %vm316_vm15 = vweird.f32 %v5204_v1  ;;  %vm4391_vm1 = vcmp.eq.f32.partialorder %v334_v49, 8.507059e+37  ;;  %v337_v14 = vor.u32 1.1754944e-38, %v336_v47  ;;  %v5234_v47 = vld [vmem:[#allocation6_spill] sm:$0xff] }
 0x13e   :  { %vm285_vm3 = vweird.f32 %v5210_v31  ;;  %v766_v42 = vsel %vm4384_vm11, %v5191_v9, %v762_v8  ;;  %v321_v55 = vand.u32 2147483648, %v5214_v41  ;;  %v314_v6 = vadd.f32 %v5204_v1, %v313_v29  ;;  %vm4411_vm7 = vmor %vm315_vm6, %vm316_vm15 }
 0x13f   :  { %v319_v35 = vand.u32 2147483647, %v5214_v41  ;;  %v747_v30 = vadd.f32 %v5207_v63, %v746_v28  ;;  %vm749_vm12 = vweird.f32 %v5207_v63  ;;  %v1379_v62 = vmul.f32 %v1363_v20, %v1347_v56  ;;  %v1361_v28 = vld [vmem:[%s4961_s2 + $0x30] sm:$0xff] }
 0x140   :  { %v1346_v57 = vmul.f32 %v1297_v48, %v1250_v58  ;;  %v770_v0 = vor.u32 1.1754944e-38, %v769_v7  ;;  %vm270_vm14 = vweird.f32 %v5220_v25  ;;  %vm271_vm2 = vweird.f32 %v5221_v18  ;;  %v5240_v7 = vld [vmem:[#allocation37_spill] sm:$0xff] }
 0x141   :  { %2434 = vmatpush.xpose.msk.msrb.mxu1 %vm1611_vm9, %v4291_v10  ;;  %2487 = vmatpush.xpose.msk.msra.mxu2 %vm1611_vm9, %v4291_v10  ;;  %v5219_v10 = vld [vmem:[#allocation16_spill] sm:$0xff]  ;;  %v1249_v52 = vsub.f32 %v353_v27, %v786_v46  ;;  %vm768_vm4 = vcmp.eq.f32.partialorder %v767_v61, 8.507059e+37  ;;  %v299_v2 = vadd.f32 %v5196_v37, %v5222_v53  ;;  %v338_v56 = vsel %vm4391_vm1, %v337_v14, %v333_v50  ;;  %v1287_v50 = vpop.permute.xlu1 %1286 }
 0x142   :  { %v754_v5 = vand.u32 2147483648, %v5219_v10  ;;  %vm748_vm11 = vweird.f32 %v5219_v10  ;;  %v752_v16 = vand.u32 2147483647, %v5219_v10  ;;  %v771_v33 = vsel %vm768_vm4, %v770_v0, %v766_v42  ;;  %v1360_v0 = vld [vmem:[%s4961_s2 + $0x28] sm:$0xff] }
 0x143   :  { %v322_v9 = vor.u32 1.1754944e-38, %v321_v55  ;;  %vm4429_vm6 = vmor %vm748_vm11, %vm749_vm12  ;;  %vm704_vm15 = vweird.f32 %v5225_v11  ;;  %v732_v39 = vadd.f32 %v5201_v19, %v5226_v13  ;;  %v318_v4 = vsel %vm4411_vm7, %v5204_v1, %v314_v6  ;;  %v5245_v55 = vld [vmem:[#allocation31_spill] sm:$0xff]  ;;  %v5258_v13 = vld [vmem:[#allocation28_spill] sm:$0xff] }
 0x144   :  { %vm4441_vm1 = vcmp.eq.f32.partialorder %v319_v35, 8.507059e+37  ;;  %v751_v26 = vsel %vm4429_vm6, %v5207_v63, %v747_v30  ;;  %vm4452_vm12 = vmor %vm300_vm5, %vm301_vm0  ;;  %v5231_v12 = vand.u32 2147483647, %v5195_v21  ;;  %v737_v32 = vand.u32 2147483647, %v5209_v23  ;;  %v5239_v63 = vld [vmem:[#allocation3_spill] sm:$0xff] }
 0x145   :  { %2435 = vmatpush.xpose.msk.msrb.mxu1 %vm1611_vm9, %v1379_v62  ;;  %2488 = vmatpush.xpose.msk.msra.mxu2 %vm1611_vm9, %v1379_v62  ;;  %v739_v54 = vand.u32 2147483648, %v5209_v23  ;;  %v755_v49 = vor.u32 1.1754944e-38, %v754_v5  ;;  %vm703_vm4 = vweird.f32 %v5234_v47  ;;  %v1378_v8 = vmul.f32 %v1362_v60, %v1346_v57  ;;  %vm4471_vm0 = vmor %vm733_vm10, %vm734_vm13  ;;  %v5241_v23 = vld [vmem:[#allocation19_spill] sm:$0xff] }
 0x146   :  { %vm4458_vm7 = vcmp.eq.f32.partialorder %v5231_v12, 8.507059e+37  ;;  %v1345_v58 = vmul.f32 %v1292_v38, %v1249_v52  ;;  %v1248_v3 = vsub.f32 %v338_v56, %v771_v33  ;;  %vm753_vm5 = vcmp.eq.f32.partialorder %v752_v16, 8.507059e+37  ;;  %vm4498_vm10 = vmor %vm285_vm3, %vm286_vm8  ;;  %v5255_v56 = vld [vmem:[#allocation26_spill] sm:$0xff] }
 0x147   :  { %v5235_v17 = vand.u32 2147483648, %v5195_v21  ;;  %v284_v40 = vadd.f32 %v5211_v34, %v5238_v36  ;;  %vm255_vm11 = vweird.f32 %v5239_v63  ;;  %v323_v21 = vsel %vm4441_vm1, %v322_v9, %v318_v4  ;;  %v5257_v9 = vld [vmem:[#allocation9_spill] sm:$0xff]  ;;  %v5260_v4 = vld [vmem:[#allocation11_spill] sm:$0xff] }
 0x148   :  { %v756_v27 = vsel %vm753_vm5, %v755_v49, %v751_v26  ;;  %v303_v46 = vsel %vm4452_vm12, %v5196_v37, %v299_v2  ;;  %v736_v44 = vsel %vm4471_vm0, %v5201_v19, %v732_v39  ;;  %v717_v20 = vadd.f32 %v5241_v23, %v5240_v7  ;;  %v5244_v19 = vld [vmem:[#allocation8_spill] sm:$0xff]  ;;  %v1282_v2 = vpop.permute.xlu2 %1281  ;;  %vm4540_vm12 = vmor %vm270_vm14, %vm271_vm2  ;;  %v1387_v16 = vld [vmem:[%s4962_s5] sm:$0xff] }
 0x149   :  { %v307_v1 = vor.u32 1.1754944e-38, %v5235_v17  ;;  %vm719_vm13 = vweird.f32 %v5241_v23  ;;  %2436 = vmatpush.xpose.msk.msrb.mxu1 %vm1611_vm9, %v1378_v8  ;;  %2489 = vmatpush.xpose.msk.msra.mxu2 %vm1611_vm9, %v1378_v8  ;;  %v740_v45 = vor.u32 1.1754944e-38, %v739_v54  ;;  %vm718_vm6 = vweird.f32 %v5244_v19  ;;  %vm4557_vm14 = vmor %vm703_vm4, %vm704_vm15  ;;  %v1359_v8 = vld [vmem:[%s4961_s2 + $0x20] sm:$0xff]  ;;  %v5268_v7 = vld [vmem:[#allocation4_spill] sm:$0xff] }
 0x14a   :  { %v722_v61 = vand.u32 2147483647, %v5244_v19  ;;  %v724_v41 = vand.u32 2147483648, %v5244_v19  ;;  %vm738_vm1 = vcmp.eq.f32.partialorder %v737_v32, 8.507059e+37  ;;  %v1377_v22 = vmul.f32 %v1361_v28, %v1345_v58  ;;  %vm4513_vm3 = vmor %vm718_vm6, %vm719_vm13  ;;  %v1408_v32 = vld [vmem:[%s4962_s5 + $0xa8] sm:$0xff] }
 0x14b   :  { %v1344_v14 = vmul.f32 %v1287_v50, %v1248_v3  ;;  %v1247_v42 = vsub.f32 %v323_v21, %v756_v27  ;;  %v269_v48 = vadd.f32 %v5221_v18, %v5245_v55  ;;  %v308_v6 = vsel %vm4458_vm7, %v307_v1, %v303_v46  ;;  %v1272_v50 = vpop.permute.xlu1 %1271 }
 0x14c   :  { %v741_v35 = vsel %vm738_vm1, %v740_v45, %v736_v44  ;;  %v5246_v30 = vand.u32 2147483648, %v5210_v31  ;;  %v702_v10 = vadd.f32 %v5225_v11, %v5249_v59  ;;  %v288_v5 = vsel %vm4498_vm10, %v5211_v34, %v284_v40  ;;  %v1277_v40 = vpop.permute.xlu0 %1276  ;;  %v1358_v44 = vld [vmem:[%s4961_s2 + $0x18] sm:$0xff]  ;;  %v1400_v34 = vld [vmem:[%s4962_s5 + $0x68] sm:$0xff] }
 0x14d   :  { %v5250_v52 = vand.u32 2147483647, %v5210_v31  ;;  %v721_v53 = vsel %vm4513_vm3, %v5241_v23, %v717_v20  ;;  %2437 = vmatpush.xpose.msk.msrb.mxu1 %vm1611_vm9, %v1377_v22  ;;  %2490 = vmatpush.xpose.msk.msra.mxu2 %vm1611_vm9, %v1377_v22  ;;  %v709_v31 = vand.u32 2147483648, %v5234_v47  ;;  %v725_v60 = vor.u32 1.1754944e-38, %v724_v41 }
 0x14e   :  { %v292_v62 = vor.u32 1.1754944e-38, %v5246_v30  ;;  %v5256_v33 = vsub.f32 1.0, %v5255_v56  ;;  %v5259_v39 = vsub.f32 1.0, %v5258_v13  ;;  %v1246_v26 = vsub.f32 %v308_v6, %v741_v35  ;;  %v1390_v56 = vld [vmem:[%s4962_s5 + $0x18] sm:$0xff]  ;;  %v1392_v13 = vld [vmem:[%s4962_s5 + $0x28] sm:$0xff] }
 0x14f   :  { %vm4527_vm8 = vcmp.eq.f32.partialorder %v5250_v52, 8.507059e+37  ;;  %vm723_vm7 = vcmp.eq.f32.partialorder %v722_v61, 8.507059e+37  ;;  %v1376_v38 = vmul.f32 %v1360_v0, %v1344_v14  ;;  %v1343_v43 = vmul.f32 %v1282_v2, %v1247_v42  ;;  %v1357_v42 = vld [vmem:[%s4961_s2 + $0x10] sm:$0xff]  ;;  %v1388_v2 = vld [vmem:[%s4962_s5 + $0x8] sm:$0xff] }
 0x150   :  { %v253_v24 = vmul.f32 %v5257_v9, %v5256_v33  ;;  %v686_v51 = vmul.f32 %v5260_v4, %v5259_v39  ;;  %v5261_v12 = vand.u32 2147483648, %v5220_v25  ;;  %v293_v54 = vsel %vm4527_vm8, %v292_v62, %v288_v5  ;;  %v1356_v62 = vld [vmem:[%s4961_s2 + $0x8] sm:$0xff]  ;;  %v1355_v5 = vld [vmem:[%s4961_s2] sm:$0xff]  ;;  %v1402_v33 = vld [vmem:[%s4962_s5 + $0x78] sm:$0xff] }
 0x151   :  { %v726_v49 = vsel %vm723_vm7, %v725_v60, %v721_v53  ;;  %vm256_vm2 = vweird.f32 %v5257_v9  ;;  %v273_v58 = vsel %vm4540_vm12, %v5221_v18, %v269_v48  ;;  %v5264_v3 = vand.u32 2147483647, %v5220_v25  ;;  %2438 = vmatpush.xpose.msk.msrb.mxu1 %vm1611_vm9, %v1376_v38  ;;  %2491 = vmatpush.xpose.msk.msra.mxu2 %vm1611_vm9, %v1376_v38  ;;  %v1399_v53 = vld [vmem:[%s4962_s5 + $0x60] sm:$0xff]  ;;  %v1401_v60 = vld [vmem:[%s4962_s5 + $0x70] sm:$0xff]  ;;  %v1404_v39 = vld [vmem:[%s4962_s5 + $0x88] sm:$0xff] }
 0x152   :  { %v277_v15 = vor.u32 1.1754944e-38, %v5261_v12  ;;  %v706_v17 = vsel %vm4557_vm14, %v5225_v11, %v702_v10  ;;  %v261_v1 = vand.u32 2147483648, %v5239_v63  ;;  %v5265_v29 = vand.u32 2147483647, %v5234_v47  ;;  %vm4586_vm0 = vmor %vm255_vm11, %vm256_vm2  ;;  %v1406_v38 = vld [vmem:[%s4962_s5 + $0x98] sm:$0xff]  ;;  %v1407_v12 = vld [vmem:[%s4962_s5 + $0xa0] sm:$0xff] }
 0x153   :  { %vm275_vm15 = vcmp.eq.f32.partialorder %v5264_v3, 8.507059e+37  ;;  %v710_v36 = vor.u32 1.1754944e-38, %v709_v31  ;;  %v254_v18 = vadd.f32 %v5257_v9, %v253_v24  ;;  %vm689_vm5 = vweird.f32 %v5260_v4  ;;  %v1389_v31 = vld [vmem:[%s4962_s5 + $0x10] sm:$0xff]  ;;  %v1403_v24 = vld [vmem:[%s4962_s5 + $0x80] sm:$0xff] }
 0x154   :  { %vm708_vm4 = vcmp.eq.f32.partialorder %v5265_v29, 8.507059e+37  ;;  %v1342_v25 = vmul.f32 %v1277_v40, %v1246_v26  ;;  %v1245_v28 = vsub.f32 %v293_v54, %v726_v49  ;;  %v687_v21 = vadd.f32 %v5260_v4, %v686_v51  ;;  %v1262_v57 = vpop.permute.xlu0 %1261  ;;  %v1405_v51 = vld [vmem:[%s4962_s5 + $0x90] sm:$0xff]  ;;  %v1394_v26 = vld [vmem:[%s4962_s5 + $0x38] sm:$0xff]  ;;  %v1411_v3 = vld [vmem:[%s4962_s5 + $0xc0] sm:$0xff] }
 0x155   :  { %v1375_v47 = vmul.f32 %v1359_v8, %v1343_v43  ;;  %v278_v27 = vsel %vm275_vm15, %v277_v15, %v273_v58  ;;  %v711_v46 = vsel %vm708_vm4, %v710_v36, %v706_v17  ;;  %v694_v23 = vand.u32 2147483648, %v5268_v7  ;;  %v1395_v43 = vld [vmem:[%s4962_s5 + $0x40] sm:$0xff]  ;;  %v1396_v15 = vld [vmem:[%s4962_s5 + $0x48] sm:$0xff]  ;;  %v1397_v54 = vld [vmem:[%s4962_s5 + $0x50] sm:$0xff] }
 0x156   :  { %vm688_vm13 = vweird.f32 %v5268_v7  ;;  %v692_v20 = vand.u32 2147483647, %v5268_v7  ;;  %v258_v45 = vsel %vm4586_vm0, %v5257_v9, %v254_v18  ;;  %v5269_v37 = vand.u32 2147483647, %v5239_v63  ;;  %v1267_v63 = vpop.permute.xlu2 %1266  ;;  %v1391_v9 = vld [vmem:[%s4962_s5 + $0x20] sm:$0xff]  ;;  %v1409_v49 = vld [vmem:[%s4962_s5 + $0xb0] sm:$0xff] }
 0x157   :  { %2439 = vmatpush.xpose.msk.msrb.mxu1 %vm1611_vm9, %v1375_v47  ;;  %2492 = vmatpush.xpose.msk.msra.mxu2 %vm1611_vm9, %v1375_v47  ;;  %v262_v19 = vor.u32 1.1754944e-38, %v261_v1  ;;  %vm690_vm10 = vmor %vm688_vm13, %vm689_vm5  ;;  %v1244_v61 = vsub.f32 %v278_v27, %v711_v46  ;;  %v1374_v41 = vmul.f32 %v1358_v44, %v1342_v25  ;;  %v1341_v22 = vmul.f32 %v1272_v50, %v1245_v28  ;;  %v1398_v8 = vld [vmem:[%s4962_s5 + $0x58] sm:$0xff]  ;;  %v1412_v17 = vld [vmem:[%s4962_s5 + $0xc8] sm:$0xff]  ;;  %v4754_v27 = vpop.permute.xlu1 %1453 }
 0x158   :  { %vm260_vm11 = vcmp.eq.f32.partialorder %v5269_v37, 8.507059e+37  ;;  %v691_v14 = vsel %vm690_vm10, %v5260_v4, %v687_v21  ;;  %v695_v55 = vor.u32 1.1754944e-38, %v694_v23  ;;  %vm693_vm6 = vcmp.eq.f32.partialorder %v692_v20, 8.507059e+37  ;;  %v1393_v4 = vld [vmem:[%s4962_s5 + $0x30] sm:$0xff]  ;;  %v1410_v58 = vld [vmem:[%s4962_s5 + $0xb8] sm:$0xff]  ;;  %v1415_v40 = vld [vmem:[%s4962_s5 + $0xe0] sm:$0xff] }
 0x159   :  { %v263_v48 = vsel %vm260_vm11, %v262_v19, %v258_v45  ;;  %v1340_v35 = vmul.f32 %v1267_v63, %v1244_v61  ;;  %v1373_v30 = vmul.f32 %v1357_v42, %v1341_v22  ;;  %v1413_v1 = vld [vmem:[%s4962_s5 + $0xd0] sm:$0xff]  ;;  %v1414_v29 = vld [vmem:[%s4962_s5 + $0xd8] sm:$0xff]  ;;  %v1416_v28 = vld [vmem:[%s4962_s5 + $0xe8] sm:$0xff] }
 0x15a   :  { %v696_v6 = vsel %vm693_vm6, %v695_v55, %v691_v14  ;;  %v1417_v47 = vld [vmem:[%s4962_s5 + $0xf0] sm:$0xff]  ;;  %v1418_v23 = vld [vmem:[%s4962_s5 + $0xf8] sm:$0xff] }
 0x15b   :  { %2440 = vmatpush.xpose.msk.msrb.mxu1 %vm1611_vm9, %v1374_v41  ;;  %2493 = vmatpush.xpose.msk.msra.mxu2 %vm1611_vm9, %v1374_v41  ;;  %v1243_v0 = vsub.f32 %v263_v48, %v696_v6  ;;  %v1372_v59 = vmul.f32 %v1356_v62, %v1340_v35 }
 0x15c   :  { %v1524_v20 = vpop.permute.xlu0 %1523 }
 0x15d   :  { %v1339_v10 = vmul.f32 %v1262_v57, %v1243_v0 }
 0x15e   :  { %v1529_v44 = vpop.permute.xlu2 %1528 }
 0x15f   :  { %2441 = vmatpush.xpose.msk.msrb.mxu1 %vm1611_vm9, %v1373_v30  ;;  %2494 = vmatpush.xpose.msk.msra.mxu2 %vm1611_vm9, %v1373_v30  ;;  %v1371_v52 = vmul.f32 %v1355_v5, %v1339_v10  ;;  %v1519_v19 = vpop.permute.xlu1 %1518 }
 0x163   :  { %2442 = vmatpush.xpose.msk.msrb.mxu1 %vm1611_vm9, %v1372_v59  ;;  %2495 = vmatpush.xpose.msk.msra.mxu2 %vm1611_vm9, %v1372_v59 }
 0x164   :  { %v1509_v35 = vpop.permute.xlu0 %1508 }
 0x166   :  { %v1514_v22 = vpop.permute.xlu2 %1513 }
 0x167   :  { %2443 = vmatpush.xpose.msk.msrb.mxu1 %vm1611_vm9, %v1371_v52  ;;  %2496 = vmatpush.xpose.msk.msra.mxu2 %vm1611_vm9, %v1371_v52  ;;  %v4768_v59 = vpop.permute.xlu1 %1608 }
 0x16a   :  { %2444 = vmatmul.msk.f32.vlgmr.msrb.gmra.mxu1 %vm1611_vm9, %v1387_v16  ;;  %2456 = vmatmul.msk.f32.vlgmr.msra.gmra.mxu2 %vm1611_vm9, %v1399_v53 }
 0x16c   :  { %v4770_v10 = vpop.permute.xlu0 %1603 }
 0x16e   :  { %v1504_v62 = vpop.permute.xlu2 %1503 }
 0x16f   :  { %v1499_v53 = vpop.permute.xlu1 %1498 }
 0x172   :  { %2445 = vmatmul.msk.f32.gmra.mxu1 %vm1611_vm9, %v1388_v2  ;;  %2457 = vmatmul.msk.f32.gmra.mxu2 %vm1611_vm9, %v1400_v34 }
 0x174   :  { %v1494_v34 = vpop.permute.xlu0 %1493 }
 0x176   :  { %v4774_v52 = vpop.permute.xlu2 %1598 }
 0x17a   :  { %2446 = vmatmul.msk.f32.gmra.mxu1 %vm1611_vm9, %v1389_v31  ;;  %2458 = vmatmul.msk.f32.gmra.mxu2 %vm1611_vm9, %v1401_v60 }
 0x17e   :  { %v1489_v60 = vpop.permute.xlu2 %1488 }
 0x182   :  { %2447 = vmatmul.msk.f32.gmra.mxu1 %vm1611_vm9, %v1390_v56  ;;  %2459 = vmatmul.msk.f32.gmra.mxu2 %vm1611_vm9, %v1402_v33  ;;  %v4780_v33 = vpop.permute.xlu1 %1593 }
 0x18a   :  { %2448 = vmatmul.msk.f32.gmra.mxu1 %vm1611_vm9, %v1391_v9  ;;  %2460 = vmatmul.msk.f32.gmra.mxu2 %vm1611_vm9, %v1403_v24  ;;  %v4782_v24 = vpop.permute.xlu0 %1588 }
 0x192   :  { %2449 = vmatmul.msk.f32.gmra.mxu1 %vm1611_vm9, %v1392_v13  ;;  %2461 = vmatmul.msk.f32.gmra.mxu2 %vm1611_vm9, %v1404_v39  ;;  %v4784_v13 = vpop.permute.xlu2 %1583 }
 0x19a   :  { %2450 = vmatmul.msk.f32.gmra.mxu1 %vm1611_vm9, %v1393_v4  ;;  %2462 = vmatmul.msk.f32.gmra.mxu2 %vm1611_vm9, %v1405_v51  ;;  %v1484_v51 = vpop.permute.xlu1 %1483 }
 0x1a2   :  { %2451 = vmatmul.msk.f32.gmra.mxu1 %vm1611_vm9, %v1394_v26  ;;  %2463 = vmatmul.msk.f32.gmra.mxu2 %vm1611_vm9, %v1406_v38  ;;  %v1479_v26 = vpop.permute.xlu0 %1478  ;;  %v1474_v38 = vpop.permute.xlu2 %1473 }
 0x1aa   :  { %2452 = vmatmul.msk.f32.gmra.mxu1 %vm1611_vm9, %v1395_v43  ;;  %2464 = vmatmul.msk.f32.gmra.mxu2 %vm1611_vm9, %v1407_v12 }
 0x1b2   :  { %2453 = vmatmul.msk.f32.gmra.mxu1 %vm1611_vm9, %v1396_v15  ;;  %2465 = vmatmul.msk.f32.gmra.mxu2 %vm1611_vm9, %v1408_v32 }
 0x1ba   :  { %2454 = vmatmul.msk.f32.gmra.mxu1 %vm1611_vm9, %v1397_v54  ;;  %2466 = vmatmul.msk.f32.gmra.mxu2 %vm1611_vm9, %v1409_v49  ;;  %v4790_v49 = vpop.permute.xlu1 %1578 }
 0x1c2   :  { %2455 = vmatmul.msk.f32.gmra.mxu1 %vm1611_vm9, %v1398_v8  ;;  %2467 = vmatmul.msk.f32.gmra.mxu2 %vm1611_vm9, %v1410_v58  ;;  %v4792_v58 = vpop.permute.xlu0 %1573 }
 0x1ca   :  { %2468 = vmatmul.msk.f32.gmra.mxu2 %vm1611_vm9, %v1411_v3 }
 0x1d2   :  { %2469 = vmatmul.msk.f32.gmra.mxu2 %vm1611_vm9, %v1412_v17 }
 0x1da   :  { %2470 = vmatmul.msk.f32.gmra.mxu2 %vm1611_vm9, %v1413_v1  ;;  %v4796_v1 = vpop.permute.xlu2 %1568 }
 0x1e2   :  { %2471 = vmatmul.msk.f32.gmra.mxu2 %vm1611_vm9, %v1414_v29 }
 0x1e7   :  { %v4736_v36 = vpop.f32.mrf.mxu1 }
 0x1ea   :  { %2472 = vmatmul.msk.f32.gmra.mxu2 %vm1611_vm9, %v1415_v40 }
 0x1ed   :  { %v1809_v18 = vpop.f32.mrf.mxu2 }
 0x1ee   :  { %v1810_v14 = vadd.f32 %v1809_v18, %v1514_v22 }
 0x1ef   :  { %v4742_v25 = vpop.f32.mrf.mxu1 }
 0x1f2   :  { %2473 = vmatmul.msk.f32.gmra.mxu2 %vm1611_vm9, %v1416_v28 }
 0x1f5   :  { %v1812_v11 = vpop.f32.mrf.mxu2 }
 0x1f6   :  { %v1813_v41 = vadd.f32 %v1812_v11, %v1519_v19  ;;  %v1459_v19 = vpop.permute.xlu2 %1458 }
 0x1f7   :  { %v4748_v21 = vpop.f32.mrf.mxu1 }
 0x1fa   :  { %2474 = vmatmul.msk.f32.gmra.mxu2 %vm1611_vm9, %v1417_v47 }
 0x1fd   :  { %v1815_v46 = vpop.f32.mrf.mxu2 }
 0x1fe   :  { %v1816_v45 = vadd.f32 %v1815_v46, %v1524_v20  ;;  %v1469_v46 = vpop.permute.xlu1 %1468 }
 0x1ff   :  { %v4756_v7 = vpop.f32.mrf.mxu1 }
 0x200   :  { %v1783_v20 = vadd.f32 %v4756_v7, %v1469_v46 }
 0x202   :  { %2475 = vmatmul.msk.f32.gmra.mxu2 %vm1611_vm9, %v1418_v23 }
 0x205   :  { %v1818_v50 = vpop.f32.mrf.mxu2 }
 0x206   :  { %v1819_v37 = vadd.f32 %v1818_v50, %v1529_v44  ;;  %v1464_v50 = vpop.permute.xlu0 %1463 }
 0x207   :  { %v4762_v61 = vpop.f32.mrf.mxu1 }
 0x208   :  { %2693 = vtanh.f32 %v1819_v37  ;;  %v1786_v47 = vadd.f32 %v4762_v61, %v1474_v38  ;;  %v1780_v37 = vadd.f32 %v4748_v21, %v1464_v50  ;;  %v1777_v61 = vadd.f32 %v4742_v25, %v1459_v19  ;;  %v1901_v25 = vld [vmem:[%s4963_s7] sm:$0xff]  ;;  %v1564_v38 = vpop.permute.xlu1 %1563 }
 0x209   :  { %2695 = vtanh.f32 %v1816_v45 }
 0x20a   :  { %2697 = vtanh.f32 %v1813_v41 }
 0x20b   :  { %2699 = vtanh.f32 %v1810_v14  ;;  %v1774_v14 = vadd.f32 %v4736_v36, %v4754_v27  ;;  %v1903_v27 = vld [vmem:[%s4963_s7 + $0x10] sm:$0xff] }
 0x20d   :  { %v4764_v42 = vpop.f32.mrf.mxu2 }
 0x20e   :  { %v2694_v55 = vpop.eup %2693 }
 0x20f   :  { %v1788_v63 = vpop.f32.mrf.mxu1  ;;  %2029 = vmatpush.msrb.mxu3 %v2694_v55  ;;  %v2696_v48 = vpop.eup %2695 }
 0x210   :  { %v2698_v6 = vpop.eup %2697  ;;  %v1789_v28 = vadd.f32 %v1788_v63, %v1479_v26 }
 0x211   :  { %2030 = vmatpush.msrb.mxu3 %v2696_v48  ;;  %v2700_v30 = vpop.eup %2699 }
 0x213   :  { %2031 = vmatpush.msrb.mxu3 %v2698_v6 }
 0x215   :  { %v4766_v57 = vpop.f32.mrf.mxu2  ;;  %2032 = vmatpush.msrb.mxu3 %v2700_v30 }
 0x217   :  { %v1791_v0 = vpop.f32.mrf.mxu1 }
 0x218   :  { %v1792_v40 = vadd.f32 %v1791_v0, %v1484_v51 }
 0x21d   :  { %v4772_v5 = vpop.f32.mrf.mxu2 }
 0x21f   :  { %v1794_v16 = vpop.f32.mrf.mxu1 }
 0x220   :  { %v1795_v17 = vadd.f32 %v1794_v16, %v1489_v60  ;;  %v1907_v16 = vld [vmem:[%s4963_s7 + $0x30] sm:$0xff] }
 0x221   :  { %v1911_v60 = vld [vmem:[%s4963_s7 + $0x50] sm:$0xff] }
 0x225   :  { %v4776_v2 = vpop.f32.mrf.mxu2 }
 0x227   :  { %v1797_v31 = vpop.f32.mrf.mxu1 }
 0x228   :  { %v1798_v8 = vadd.f32 %v1797_v31, %v1494_v34  ;;  %v1909_v34 = vld [vmem:[%s4963_s7 + $0x40] sm:$0xff] }
 0x22d   :  { %v4778_v56 = vpop.f32.mrf.mxu2 }
 0x22f   :  { %v1800_v9 = vpop.f32.mrf.mxu1 }
 0x230   :  { %v1801_v54 = vadd.f32 %v1800_v9, %v1499_v53 }
 0x235   :  { %v4786_v39 = vpop.f32.mrf.mxu2 }
 0x237   :  { %v1803_v4 = vpop.f32.mrf.mxu1 }
 0x238   :  { %v1804_v15 = vadd.f32 %v1803_v4, %v1504_v62  ;;  %v1905_v62 = vld [vmem:[%s4963_s7 + $0x20] sm:$0xff] }
 0x23d   :  { %v4788_v43 = vpop.f32.mrf.mxu2 }
 0x23f   :  { %v1806_v12 = vpop.f32.mrf.mxu1 }
 0x240   :  { %v1807_v32 = vadd.f32 %v1806_v12, %v1509_v35 }
 0x242   :  { %2701 = vtanh.f32 %v1807_v32 }
 0x243   :  { %2703 = vtanh.f32 %v1804_v15  ;;  %v1913_v15 = vld [vmem:[%s4963_s7 + $0x60] sm:$0xff] }
 0x244   :  { %2705 = vtanh.f32 %v1801_v54  ;;  %v1559_v54 = vpop.permute.xlu0 %1558 }
 0x245   :  { %v4794_v3 = vpop.f32.mrf.mxu2  ;;  %2707 = vtanh.f32 %v1798_v8 }
 0x246   :  { %2709 = vtanh.f32 %v1795_v17  ;;  %v1843_v17 = vadd.f32 %v4794_v3, %v4796_v1 }
 0x247   :  { %2711 = vtanh.f32 %v1792_v40  ;;  %v1840_v40 = vadd.f32 %v4788_v43, %v1564_v38  ;;  %v1917_v43 = vld [vmem:[%s4963_s7 + $0x80] sm:$0xff] }
 0x248   :  { %v2702_v29 = vpop.eup %2701  ;;  %2713 = vtanh.f32 %v1789_v28  ;;  %v1837_v28 = vadd.f32 %v4786_v39, %v1559_v54 }
 0x249   :  { %2033 = vmatpush.msrb.mxu3 %v2702_v29  ;;  %v2704_v18 = vpop.eup %2703  ;;  %2715 = vtanh.f32 %v1786_v47 }
 0x24a   :  { %v2706_v11 = vpop.eup %2705  ;;  %2717 = vtanh.f32 %v1783_v20 }
 0x24b   :  { %2034 = vmatpush.msrb.mxu3 %v2704_v18  ;;  %v2708_v23 = vpop.eup %2707  ;;  %2719 = vtanh.f32 %v1780_v37  ;;  %v1549_v18 = vpop.permute.xlu2 %1548 }
 0x24c   :  { %v2710_v45 = vpop.eup %2709  ;;  %2721 = vtanh.f32 %v1777_v61  ;;  %v1831_v47 = vadd.f32 %v4776_v2, %v1549_v18  ;;  %v1544_v46 = vpop.permute.xlu0 %1543 }
 0x24d   :  { %v4799_v44 = vpop.f32.mrf.mxu2  ;;  %2035 = vmatpush.msrb.mxu3 %v2706_v11  ;;  %v2712_v41 = vpop.eup %2711  ;;  %2723 = vtanh.f32 %v1774_v14  ;;  %v1828_v39 = vadd.f32 %v4772_v5, %v1544_v46  ;;  %v1919_v5 = vld [vmem:[%s4963_s7 + $0x90] sm:$0xff]  ;;  %v1904_v14 = vld [vmem:[%s4963_s7 + $0x18] sm:$0xff] }
 0x24e   :  { %v2714_v22 = vpop.eup %2713 }
 0x24f   :  { %2036 = vmatpush.msrb.mxu3 %v2708_v23  ;;  %v2716_v55 = vpop.eup %2715 }
 0x250   :  { %v2718_v63 = vpop.eup %2717 }
 0x251   :  { %2037 = vmatpush.msrb.mxu3 %v2710_v45  ;;  %v2720_v21 = vpop.eup %2719 }
 0x252   :  { %v2722_v48 = vpop.eup %2721 }
 0x253   :  { %2038 = vmatpush.msrb.mxu3 %v2712_v41  ;;  %v2724_v35 = vpop.eup %2723  ;;  %v1534_v50 = vpop.permute.xlu2 %1533 }
 0x254   :  { %v1822_v45 = vadd.f32 %v4764_v42, %v1534_v50  ;;  %v1902_v42 = vld [vmem:[%s4963_s7 + $0x8] sm:$0xff] }
 0x255   :  { %v1848_v7 = vpop.f32.mrf.mxu2  ;;  %2039 = vmatpush.msrb.mxu3 %v2714_v22  ;;  %v1921_v22 = vld [vmem:[%s4963_s7 + $0xa0] sm:$0xff] }
 0x257   :  { %2040 = vmatpush.msrb.mxu3 %v2716_v55  ;;  %v1906_v55 = vld [vmem:[%s4963_s7 + $0x28] sm:$0xff] }
 0x259   :  { %2041 = vmatpush.msrb.mxu3 %v2718_v63  ;;  %v1925_v63 = vld [vmem:[%s4963_s7 + $0xc0] sm:$0xff] }
 0x25b   :  { %2042 = vmatpush.msrb.mxu3 %v2720_v21  ;;  %v1908_v21 = vld [vmem:[%s4963_s7 + $0x38] sm:$0xff] }
 0x25d   :  { %v1851_v6 = vpop.f32.mrf.mxu2  ;;  %2043 = vmatpush.msrb.mxu3 %v2722_v48  ;;  %v1927_v48 = vld [vmem:[%s4963_s7 + $0xd0] sm:$0xff] }
 0x25f   :  { %2044 = vmatpush.msrb.mxu3 %v2724_v35  ;;  %v1912_v35 = vld [vmem:[%s4963_s7 + $0x58] sm:$0xff] }
 0x260   :  { %2045 = vmatmul.f32.vlgmr.msrb.gmra.mxu3 %v1901_v25  ;;  %v1929_v25 = vld [vmem:[%s4963_s7 + $0xe0] sm:$0xff] }
 0x265   :  { %v1854_v36 = vpop.f32.mrf.mxu2 }
 0x266   :  { %v1855_v12 = vadd.f32 %v1854_v36, %v4782_v24  ;;  %v1846_v24 = vadd.f32 %v4799_v44, %v4792_v58  ;;  %v1931_v36 = vld [vmem:[%s4963_s7 + $0xf0] sm:$0xff] }
 0x268   :  { %2048 = vmatmul.f32.gmra.mxu3 %v1903_v27  ;;  %v1914_v27 = vld [vmem:[%s4963_s7 + $0x68] sm:$0xff] }
 0x26d   :  { %v1857_v30 = vpop.f32.mrf.mxu2 }
 0x26e   :  { %v1858_v26 = vadd.f32 %v1857_v30, %v4780_v33  ;;  %v1916_v30 = vld [vmem:[%s4963_s7 + $0x78] sm:$0xff] }
 0x270   :  { %2051 = vmatmul.f32.gmra.mxu3 %v1905_v62  ;;  %v1918_v62 = vld [vmem:[%s4963_s7 + $0x88] sm:$0xff] }
 0x275   :  { %v1860_v0 = vpop.f32.mrf.mxu2 }
 0x276   :  { %v1861_v51 = vadd.f32 %v1860_v0, %v4774_v52  ;;  %v1849_v52 = vadd.f32 %v1848_v7, %v4790_v49  ;;  %v1915_v49 = vld [vmem:[%s4963_s7 + $0x70] sm:$0xff]  ;;  %v1920_v0 = vld [vmem:[%s4963_s7 + $0x98] sm:$0xff] }
 0x277   :  { %v1923_v7 = vld [vmem:[%s4963_s7 + $0xb0] sm:$0xff] }
 0x278   :  { %2054 = vmatmul.f32.gmra.mxu3 %v1907_v16  ;;  %v1922_v16 = vld [vmem:[%s4963_s7 + $0xa8] sm:$0xff] }
 0x27d   :  { %v1863_v53 = vpop.f32.mrf.mxu2 }
 0x27e   :  { %v1864_v9 = vadd.f32 %v1863_v53, %v4770_v10  ;;  %v1852_v10 = vadd.f32 %v1851_v6, %v4784_v13  ;;  %v1554_v13 = vpop.permute.xlu1 %1553  ;;  %v1910_v6 = vld [vmem:[%s4963_s7 + $0x48] sm:$0xff]  ;;  %v1924_v53 = vld [vmem:[%s4963_s7 + $0xb8] sm:$0xff] }
 0x27f   :  { %v1834_v1 = vadd.f32 %v4778_v56, %v1554_v13 }
 0x280   :  { %2057 = vmatmul.f32.gmra.mxu3 %v1909_v34 }
 0x285   :  { %v1866_v31 = vpop.f32.mrf.mxu2 }
 0x286   :  { %v1867_v4 = vadd.f32 %v1866_v31, %v4768_v59  ;;  %v1539_v23 = vpop.permute.xlu1 %1538 }
 0x287   :  { %v1825_v56 = vadd.f32 %v4766_v57, %v1539_v23 }
 0x288   :  { %2725 = vtanh.f32 %v1867_v4  ;;  %2060 = vmatmul.f32.gmra.mxu3 %v1911_v60  ;;  %v1952_v60 = vpop.permute.xlu0 %1951  ;;  %v1962_v4 = vpop.permute.xlu2 %1961 }
 0x289   :  { %2727 = vtanh.f32 %v1864_v9  ;;  %v1926_v9 = vld [vmem:[%s4963_s7 + $0xc8] sm:$0xff] }
 0x28a   :  { %2729 = vtanh.f32 %v1861_v51 }
 0x28b   :  { %2731 = vtanh.f32 %v1858_v26  ;;  %v1928_v26 = vld [vmem:[%s4963_s7 + $0xd8] sm:$0xff] }
 0x28c   :  { %2733 = vtanh.f32 %v1855_v12 }
 0x28d   :  { %2735 = vtanh.f32 %v1852_v10 }
 0x28e   :  { %v2726_v32 = vpop.eup %2725  ;;  %2737 = vtanh.f32 %v1849_v52  ;;  %v1957_v31 = vpop.permute.xlu1 %1956 }
 0x28f   :  { %2094 = vmatpush.msrb.mxu0 %v2726_v32  ;;  %v2728_v59 = vpop.eup %2727  ;;  %2739 = vtanh.f32 %v1846_v24 }
 0x290   :  { %2063 = vmatmul.f32.gmra.mxu3 %v1913_v15  ;;  %v2730_v33 = vpop.eup %2729  ;;  %2741 = vtanh.f32 %v1843_v17  ;;  %v1967_v12 = vpop.permute.xlu0 %1966  ;;  %v1930_v15 = vld [vmem:[%s4963_s7 + $0xe8] sm:$0xff] }
 0x291   :  { %2095 = vmatpush.msrb.mxu0 %v2728_v59  ;;  %v2732_v8 = vpop.eup %2731  ;;  %2743 = vtanh.f32 %v1840_v40  ;;  %v4917_v32 = vpop.permute.xlu2 %1976 }
 0x292   :  { %v2734_v29 = vpop.eup %2733  ;;  %2745 = vtanh.f32 %v1837_v28 }
 0x293   :  { %2096 = vmatpush.msrb.mxu0 %v2730_v33  ;;  %v2736_v58 = vpop.eup %2735  ;;  %2747 = vtanh.f32 %v1834_v1  ;;  %v1932_v33 = vld [vmem:[%s4963_s7 + $0xf8] sm:$0xff] }
 0x294   :  { %v2738_v3 = vpop.eup %2737  ;;  %2749 = vtanh.f32 %v1831_v47 }
 0x295   :  { %2097 = vmatpush.msrb.mxu0 %v2732_v8  ;;  %v2740_v11 = vpop.eup %2739  ;;  %2751 = vtanh.f32 %v1828_v39 }
 0x296   :  { %v2742_v44 = vpop.eup %2741  ;;  %2753 = vtanh.f32 %v1825_v56  ;;  %v1972_v38 = vpop.permute.xlu1 %1971 }
 0x297   :  { %2098 = vmatpush.msrb.mxu0 %v2734_v29  ;;  %v2744_v20 = vpop.eup %2743  ;;  %2755 = vtanh.f32 %v1822_v45 }
 0x298   :  { %2066 = vmatmul.f32.gmra.mxu3 %v1915_v49  ;;  %v2746_v2 = vpop.eup %2745  ;;  %v4921_v52 = vpop.permute.xlu0 %1981 }
 0x299   :  { %2099 = vmatpush.msrb.mxu0 %v2736_v58  ;;  %v2748_v37 = vpop.eup %2747  ;;  %v4926_v24 = vpop.permute.xlu2 %1991 }
 0x29a   :  { %v2750_v19 = vpop.eup %2749 }
 0x29b   :  { %2100 = vmatpush.msrb.mxu0 %v2738_v3  ;;  %v2752_v57 = vpop.eup %2751 }
 0x29c   :  { %v2754_v41 = vpop.eup %2753 }
 0x29d   :  { %2101 = vmatpush.msrb.mxu0 %v2740_v11  ;;  %v2756_v61 = vpop.eup %2755 }
 0x29e   :  { %v4919_v59 = vpop.permute.xlu1 %1986 }
 0x29f   :  { %2102 = vmatpush.msrb.mxu0 %v2742_v44 }
 0x2a0   :  { %2069 = vmatmul.f32.gmra.mxu3 %v1917_v43  ;;  %v4930_v17 = vpop.permute.xlu0 %1996 }
 0x2a1   :  { %2103 = vmatpush.msrb.mxu0 %v2744_v20  ;;  %v4932_v40 = vpop.permute.xlu2 %2006 }
 0x2a3   :  { %2104 = vmatpush.msrb.mxu0 %v2746_v2 }
 0x2a5   :  { %2105 = vmatpush.msrb.mxu0 %v2748_v37 }
 0x2a6   :  { %v4928_v8 = vpop.permute.xlu1 %2001 }
 0x2a7   :  { %2106 = vmatpush.msrb.mxu0 %v2750_v19 }
 0x2a8   :  { %2072 = vmatmul.f32.gmra.mxu3 %v1919_v5  ;;  %v4936_v28 = vpop.permute.xlu0 %2011 }
 0x2a9   :  { %2107 = vmatpush.msrb.mxu0 %v2752_v57  ;;  %v4938_v46 = vpop.permute.xlu2 %2021 }
 0x2ab   :  { %2108 = vmatpush.msrb.mxu0 %v2754_v41 }
 0x2ad   :  { %2109 = vmatpush.msrb.mxu0 %v2756_v61 }
 0x2ae   :  { %2110 = vmatmul.f32.vlgmr.msrb.gmra.mxu0 %v1902_v42  ;;  %v4934_v58 = vpop.permute.xlu1 %2016 }
 0x2b0   :  { %2075 = vmatmul.f32.gmra.mxu3 %v1921_v22  ;;  %v2194_v56 = vpop.permute.xlu0 %2193 }
 0x2b1   :  { %v2204_v41 = vpop.permute.xlu2 %2203 }
 0x2b6   :  { %2113 = vmatmul.f32.gmra.mxu0 %v1904_v14  ;;  %v2199_v20 = vpop.permute.xlu1 %2198 }
 0x2b8   :  { %2078 = vmatmul.f32.gmra.mxu3 %v1923_v7 }
 0x2be   :  { %2116 = vmatmul.f32.gmra.mxu0 %v1906_v55 }
 0x2c0   :  { %2081 = vmatmul.f32.gmra.mxu3 %v1925_v63 }
 0x2c6   :  { %2119 = vmatmul.f32.gmra.mxu0 %v1908_v21  ;;  %v2209_v21 = vpop.permute.xlu0 %2208 }
 0x2c8   :  { %2084 = vmatmul.f32.gmra.mxu3 %v1927_v48 }
 0x2ce   :  { %2122 = vmatmul.f32.gmra.mxu0 %v1910_v6 }
 0x2d0   :  { %2087 = vmatmul.f32.gmra.mxu3 %v1929_v25 }
 0x2d6   :  { %2125 = vmatmul.f32.gmra.mxu0 %v1912_v35 }
 0x2d8   :  { %2090 = vmatmul.f32.gmra.mxu3 %v1931_v36 }
 0x2de   :  { %2128 = vmatmul.f32.gmra.mxu0 %v1914_v27 }
 0x2e3   :  { %v2046_v34 = vpop.f32.mrf.mxu3 }
 0x2e4   :  { %v2047_v13 = vadd.f32 %v2046_v34, %v1952_v60 }
 0x2e6   :  { %2131 = vmatmul.f32.gmra.mxu0 %v1916_v30  ;;  %v2214_v30 = vpop.permute.xlu1 %2213 }
 0x2eb   :  { %v2049_v51 = vpop.f32.mrf.mxu3 }
 0x2ec   :  { %v2050_v3 = vadd.f32 %v2049_v51, %v1957_v31 }
 0x2ee   :  { %2134 = vmatmul.f32.gmra.mxu0 %v1918_v62 }
 0x2f3   :  { %v2052_v10 = vpop.f32.mrf.mxu3 }
 0x2f4   :  { %v2053_v43 = vadd.f32 %v2052_v10, %v1962_v4 }
 0x2f6   :  { %2137 = vmatmul.f32.gmra.mxu0 %v1920_v0 }
 0x2fb   :  { %v2055_v54 = vpop.f32.mrf.mxu3 }
 0x2fc   :  { %v2056_v5 = vadd.f32 %v2055_v54, %v1967_v12 }
 0x2fe   :  { %2140 = vmatmul.f32.gmra.mxu0 %v1922_v16 }
 0x303   :  { %v2058_v18 = vpop.f32.mrf.mxu3 }
 0x304   :  { %v2059_v7 = vadd.f32 %v2058_v18, %v1972_v38 }
 0x306   :  { %2143 = vmatmul.f32.gmra.mxu0 %v1924_v53 }
 0x30b   :  { %v2061_v44 = vpop.f32.mrf.mxu3 }
 0x30c   :  { %v2062_v10 = vadd.f32 %v2061_v44, %v4917_v32 }
 0x30e   :  { %2146 = vmatmul.f32.gmra.mxu0 %v1926_v9 }
 0x313   :  { %v2064_v61 = vpop.f32.mrf.mxu3 }
 0x314   :  { %v2065_v54 = vadd.f32 %v2064_v61, %v4921_v52 }
 0x316   :  { %2149 = vmatmul.f32.gmra.mxu0 %v1928_v26 }
 0x31b   :  { %v2067_v25 = vpop.f32.mrf.mxu3 }
 0x31c   :  { %v2068_v18 = vadd.f32 %v2067_v25, %v4919_v59 }
 0x31e   :  { %2152 = vmatmul.f32.gmra.mxu0 %v1930_v15  ;;  %v2219_v15 = vpop.permute.xlu2 %2218 }
 0x323   :  { %v2070_v16 = vpop.f32.mrf.mxu3 }
 0x326   :  { %2155 = vmatmul.f32.gmra.mxu0 %v1932_v33  ;;  %v2224_v33 = vpop.permute.xlu0 %2223 }
 0x32b   :  { %v2111_v49 = vpop.f32.mrf.mxu0  ;;  %v2073_v34 = vpop.f32.mrf.mxu3 }
 0x32c   :  { %v2112_v29 = vadd.f32 %v2111_v49, %v2047_v13 }
 0x32e   :  { %2757 = vtanh.f32 %v2112_v29 }
 0x333   :  { %v2114_v1 = vpop.f32.mrf.mxu0  ;;  %v2076_v9 = vpop.f32.mrf.mxu3 }
 0x334   :  { %v2115_v11 = vadd.f32 %v2114_v1, %v2050_v3  ;;  %v2758_v47 = vpop.eup %2757  ;;  %v2229_v1 = vpop.permute.xlu1 %2228  ;;  %v2077_v32 = vadd.f32 %v2076_v9, %v4928_v8 }
 0x335   :  { %v2271_v2 = vmul.f32 %v2758_v47, %v2194_v56  ;;  %v2239_v56 = vpop.permute.xlu0 %2238 }
 0x336   :  { %2759 = vtanh.f32 %v2115_v11  ;;  %v2071_v11 = vadd.f32 %v2070_v16, %v4926_v24 }
 0x33b   :  { %v2117_v39 = vpop.f32.mrf.mxu0  ;;  %v2079_v51 = vpop.f32.mrf.mxu3 }
 0x33c   :  { %v2760_v23 = vpop.eup %2759  ;;  %v2118_v50 = vadd.f32 %v2117_v39, %v2053_v43  ;;  %v2074_v43 = vadd.f32 %v2073_v34, %v4930_v17  ;;  %v2080_v59 = vadd.f32 %v2079_v51, %v4932_v40 }
 0x33d   :  { %v2272_v45 = vmul.f32 %v2760_v23, %v2199_v20  ;;  %v2234_v23 = vpop.permute.xlu2 %2233  ;;  %v2249_v25 = vpop.permute.xlu0 %2248 }
 0x33e   :  { %2761 = vtanh.f32 %v2118_v50 }
 0x33f   :  { %v2287_v37 = vadd.f32 %v2272_v45, %v2271_v2 }
 0x343   :  { %v2120_v19 = vpop.f32.mrf.mxu0  ;;  %v2082_v38 = vpop.f32.mrf.mxu3 }
 0x344   :  { %v2762_v57 = vpop.eup %2761  ;;  %v2121_v42 = vadd.f32 %v2120_v19, %v2056_v5  ;;  %v2083_v45 = vadd.f32 %v2082_v38, %v4936_v28  ;;  %v2027_v19 = vpop.permute.xlu1 %2026 }
 0x345   :  { %v2273_v22 = vmul.f32 %v2762_v57, %v2204_v41  ;;  %v2244_v28 = vpop.permute.xlu2 %2243 }
 0x346   :  { %2763 = vtanh.f32 %v2121_v42 }
 0x347   :  { %v2288_v14 = vadd.f32 %v2287_v37, %v2273_v22 }
 0x34b   :  { %v2123_v55 = vpop.f32.mrf.mxu0  ;;  %v2085_v49 = vpop.f32.mrf.mxu3 }
 0x34c   :  { %v2764_v63 = vpop.eup %2763  ;;  %v2124_v48 = vadd.f32 %v2123_v55, %v2059_v7  ;;  %v2086_v8 = vadd.f32 %v2085_v49, %v4934_v58 }
 0x34d   :  { %v2274_v6 = vmul.f32 %v2764_v63, %v2209_v21  ;;  %v2259_v38 = vpop.permute.xlu2 %2258 }
 0x34e   :  { %2765 = vtanh.f32 %v2124_v48 }
 0x34f   :  { %v2289_v35 = vadd.f32 %v2288_v14, %v2274_v6 }
 0x353   :  { %v2126_v36 = vpop.f32.mrf.mxu0  ;;  %v2088_v2 = vpop.f32.mrf.mxu3 }
 0x354   :  { %v2766_v27 = vpop.eup %2765  ;;  %v2127_v13 = vadd.f32 %v2126_v36, %v2062_v10  ;;  %v2089_v61 = vadd.f32 %v2088_v2, %v4938_v46  ;;  %v2264_v10 = vpop.permute.xlu0 %2263 }
 0x355   :  { %v2275_v62 = vmul.f32 %v2766_v27, %v2214_v30 }
 0x356   :  { %2767 = vtanh.f32 %v2127_v13 }
 0x357   :  { %v2290_v0 = vadd.f32 %v2289_v35, %v2275_v62 }
 0x35b   :  { %v2129_v53 = vpop.f32.mrf.mxu0  ;;  %v2091_v58 = vpop.f32.mrf.mxu3 }
 0x35c   :  { %v2130_v3 = vadd.f32 %v2129_v53, %v2065_v54  ;;  %v2768_v20 = vpop.eup %2767  ;;  %v2092_v16 = vadd.f32 %v2091_v58, %v2027_v19 }
 0x35d   :  { %v2276_v37 = vmul.f32 %v2768_v20, %v2219_v15 }
 0x35e   :  { %2769 = vtanh.f32 %v2130_v3 }
 0x35f   :  { %v2291_v22 = vadd.f32 %v2290_v0, %v2276_v37  ;;  %v2254_v0 = vpop.permute.xlu1 %2253 }
 0x363   :  { %v2132_v31 = vpop.f32.mrf.mxu0 }
 0x364   :  { %v2133_v47 = vadd.f32 %v2132_v31, %v2068_v18  ;;  %v2770_v24 = vpop.eup %2769 }
 0x365   :  { %v2277_v41 = vmul.f32 %v2770_v24, %v2224_v33 }
 0x366   :  { %2771 = vtanh.f32 %v2133_v47 }
 0x367   :  { %v2292_v21 = vadd.f32 %v2291_v22, %v2277_v41 }
 0x36b   :  { %v2135_v60 = vpop.f32.mrf.mxu0 }
 0x36c   :  { %v2136_v39 = vadd.f32 %v2135_v60, %v2071_v11  ;;  %v2772_v5 = vpop.eup %2771 }
 0x36d   :  { %v2278_v14 = vmul.f32 %v2772_v5, %v2229_v1 }
 0x36e   :  { %2773 = vtanh.f32 %v2136_v39 }
 0x36f   :  { %v2293_v35 = vadd.f32 %v2292_v21, %v2278_v14 }
 0x373   :  { %v2138_v4 = vpop.f32.mrf.mxu0 }
 0x374   :  { %v2139_v52 = vadd.f32 %v2138_v4, %v2074_v43  ;;  %v2774_v42 = vpop.eup %2773 }
 0x375   :  { %v2279_v48 = vmul.f32 %v2774_v42, %v2234_v23  ;;  %v2312_v23 = vpop.permute.xlu2 %2311 }
 0x376   :  { %2775 = vtanh.f32 %v2139_v52  ;;  %v2314_v52 = vperm.slane %v2312_v23, 0 }
 0x377   :  { %v2294_v46 = vadd.f32 %v2293_v35, %v2279_v48 }
 0x37b   :  { %v2141_v26 = vpop.f32.mrf.mxu0 }
 0x37c   :  { %v2142_v50 = vadd.f32 %v2141_v26, %v2077_v32  ;;  %v2776_v55 = vpop.eup %2775 }
 0x37d   :  { %v2280_v36 = vmul.f32 %v2776_v55, %v2239_v56 }
 0x37e   :  { %2777 = vtanh.f32 %v2142_v50 }
 0x37f   :  { %v2295_v53 = vadd.f32 %v2294_v46, %v2280_v36 }
 0x383   :  { %v2144_v12 = vpop.f32.mrf.mxu0 }
 0x384   :  { %v2145_v17 = vadd.f32 %v2144_v12, %v2080_v59  ;;  %v2778_v6 = vpop.eup %2777 }
 0x385   :  { %v2281_v30 = vmul.f32 %v2778_v6, %v2244_v28 }
 0x386   :  { %2779 = vtanh.f32 %v2145_v17 }
 0x387   :  { %v2296_v4 = vadd.f32 %v2295_v53, %v2281_v30 }
 0x38b   :  { %v2147_v29 = vpop.f32.mrf.mxu0 }
 0x38c   :  { %v2148_v57 = vadd.f32 %v2147_v29, %v2083_v45  ;;  %v2780_v27 = vpop.eup %2779  ;;  %v2269_v29 = vpop.permute.xlu1 %2268 }
 0x38d   :  { %v2282_v34 = vmul.f32 %v2780_v27, %v2249_v25 }
 0x38e   :  { %2781 = vtanh.f32 %v2148_v57 }
 0x38f   :  { %v2297_v12 = vadd.f32 %v2296_v4, %v2282_v34 }
 0x393   :  { %v2150_v44 = vpop.f32.mrf.mxu0 }
 0x394   :  { %v2151_v40 = vadd.f32 %v2150_v44, %v2086_v8  ;;  %v2782_v62 = vpop.eup %2781 }
 0x395   :  { %v2283_v51 = vmul.f32 %v2782_v62, %v2254_v0 }
 0x396   :  { %2783 = vtanh.f32 %v2151_v40 }
 0x397   :  { %v2298_v33 = vadd.f32 %v2297_v12, %v2283_v51 }
 0x39b   :  { %v2153_v7 = vpop.f32.mrf.mxu0 }
 0x39c   :  { %v2154_v63 = vadd.f32 %v2153_v7, %v2089_v61  ;;  %v2784_v60 = vpop.eup %2783 }
 0x39d   :  { %v2284_v15 = vmul.f32 %v2784_v60, %v2259_v38 }
 0x39e   :  { %2785 = vtanh.f32 %v2154_v63 }
 0x39f   :  { %v2299_v13 = vadd.f32 %v2298_v33, %v2284_v15 }
 0x3a3   :  { %v2156_v31 = vpop.f32.mrf.mxu0 }
 0x3a4   :  { %v2157_v9 = vadd.f32 %v2156_v31, %v2092_v16  ;;  %v2786_v26 = vpop.eup %2785 }
 0x3a5   :  { %v2285_v54 = vmul.f32 %v2786_v26, %v2264_v10 }
 0x3a6   :  { %2787 = vtanh.f32 %v2157_v9 }
 0x3a7   :  { %v2300_v18 = vadd.f32 %v2299_v13, %v2285_v54 }
 0x3ac   :  { %v2788_v49 = vpop.eup %2787 }
 0x3ad   :  { %v2286_v3 = vmul.f32 %v2788_v49, %v2269_v29 }
 0x3af   :  { %v2301_v1 = vadd.f32 %v2300_v18, %v2286_v3 }
 0x3b1   :  { %v2302_v11 = vrot.slane %v2301_v1, 4 }
 0x3b3   :  { %v2303_v47 = vadd.f32 %v2302_v11, %v2301_v1 }
 0x3b5   :  { %v2304_v43 = vrot.slane %v2303_v47, 2 }
 0x3b7   :  { %v2305_v39 = vadd.f32 %v2304_v43, %v2303_v47 }
 0x3b9   :  { %v2306_v32 = vrot.slane %v2305_v39, 1 }
 0x3bb   :  { %v2307_v44 = vadd.f32 %v2306_v32, %v2305_v39 }
 0x3bd   :  { %v2315_v20 = vadd.f32 %v2314_v52, %v2307_v44 }
 0x3bf   :  { %v2476_v56 = vmul.f32 -1.442695, %v2315_v20 }
 0x3c1   :  { %2789 = vpow2.f32 %v2476_v56 }
 0x3c7   :  { %v2790_v59 = vpop.eup %2789 }
 0x3c8   :  { %v2319_v50 = vadd.f32 1.0, %v2790_v59 }
 0x3ca   :  { %2791 = vrcp.f32 %v2319_v50  ;;  %v2331_v17 = vand.u32 2147483648, %v2319_v50  ;;  %v2329_v5 = vand.u32 2147483647, %v2319_v50  ;;  %vm2325_vm1 = vweird.f32 %v2319_v50 }
 0x3cc   :  { %v2332_v8 = vor.u32 1.1754944e-38, %v2331_v17  ;;  %vm2330_vm8 = vcmp.eq.f32.partialorder %v2329_v5, 8.507059e+37 }
 0x3d0   :  { %v2792_v2 = vpop.eup %2791 }
 0x3d1   :  { %v2321_v24 = vmul.f32 %v2792_v2, %v2319_v50  ;;  %vm2326_vm9 = vweird.f32 %v2792_v2 }
 0x3d2   :  { %vm2327_vm3 = vmor %vm2325_vm1, %vm2326_vm9 }
 0x3d3   :  { %v2322_v45 = vsub.f32 1.0, %v2321_v24 }
 0x3d5   :  { %v2323_v37 = vmul.f32 %v2792_v2, %v2322_v45 }
 0x3d7   :  { %v2324_v19 = vadd.f32 %v2792_v2, %v2323_v37 }
 0x3d9   :  { %v2328_v57 = vsel %vm2327_vm3, %v2792_v2, %v2324_v19 }
 0x3da   :  { %v2333_v41 = vsel %vm2330_vm8, %v2332_v8, %v2328_v57 }
 0x3db   :  { %2335 = vst [vmem:[%s4964_s11] sm:$0x1] %v2333_v41 }

</bundles_post_ra>
